<compile_context>
chip_gen: v5e
topology: v5e:2x2
jax: 0.10.0
libtpu: 0.0.40
codegen_flags: <defaults>
</compile_context>

<pallas_src>
import functools

import jax
import jax.numpy as jnp
from jax.experimental import pallas as pl
from jax.experimental.pallas import tpu as pltpu


def _inverted_residual_kernel(x_ref, w1_ref, b1_ref, wd_ref, b2_ref,
                              w3_ref, b3_ref, o_ref, *, H, W, th, residual):
    """One (batch, row-tile) grid step.

    x_ref : (1, Cin, H*W + 2*(W+1))  flattened NCHW input, padded by W+1 zeros
                                     on both ends; resident across the row axis.
    w1_ref: (Cm, Cin)    1x1 expansion weights (BN scale folded in)
    b1_ref: (Cm, 1)      expansion BN bias
    wd_ref: (9, Cm, 1)   3x3 depthwise weights, tap-major (dy, dx), BN folded
    b2_ref: (Cm, 1)      depthwise BN bias
    w3_ref: (Cout, Cm)   1x1 projection weights (BN scale folded in)
    b3_ref: (Cout, 1)    projection BN bias
    o_ref : (1, Cout, th*W)
    """
    cin = x_ref.shape[1]
    cm = w1_ref.shape[0]
    hw = H * W
    thw = th * W                 # output lanes of this tile
    win = thw + 2 * W + 2        # input window: tile + 1 halo row + 1 elem each side

    t = pl.program_id(1)
    start = t * thw              # window start in padded flattened coordinates
    if thw % 128 == 0:
        start = pl.multiple_of(start, 128)

    xw = x_ref[0, :, pl.ds(start, win)].astype(jnp.float32)     # (Cin, win)

    # ---- 1x1 expansion conv (BN scale pre-folded) + bias + ReLU6 ----
    if cin <= 8:
        # Tiny contraction dim: VPU broadcast-MAC instead of a K=cin MXU matmul.
        h = w1_ref[:, 0:1] * xw[0:1, :]
        for ci in range(1, cin):
            h = h + w1_ref[:, ci:ci + 1] * xw[ci:ci + 1, :]
    else:
        h = jnp.dot(w1_ref[...], xw, preferred_element_type=jnp.float32)
    h = jnp.clip(h + b1_ref[...], 0.0, 6.0)                     # (Cm, win)

    # Zero the halo positions that fall outside the image: the depthwise conv
    # zero-pads its *expanded* input, whereas expanding the zero-padded x rows
    # would leave clip(b1, 0, 6) there.
    p_idx = jax.lax.broadcasted_iota(jnp.int32, (1, win), 1)
    f_idx = start + p_idx - (W + 1)          # original flattened spatial index
    h = jnp.where((f_idx >= 0) & (f_idx < hw), h, 0.0)

    # ---- 3x3 depthwise conv (stride 1, pad 1) + bias + ReLU6 ----
    # Tap (dy, dx) of output position q reads window position q+(dy+1)*W+dx+1,
    # i.e. a static lane-offset slice. Vertical padding is already baked into
    # h (zeros above); column edges are handled with masks.
    col = jax.lax.broadcasted_iota(jnp.int32, (1, thw), 1) % W
    not_left = col > 0
    not_right = col < (W - 1)

    acc = jnp.zeros((cm, thw), jnp.float32)
    for dy in (-1, 0, 1):
        for dx in (-1, 0, 1):
            s = (dy + 1) * W + dx + 1
            tap = h[:, s:s + thw]
            if dx == -1:
                tap = jnp.where(not_left, tap, 0.0)
            elif dx == 1:
                tap = jnp.where(not_right, tap, 0.0)
            acc = acc + tap * wd_ref[(dy + 1) * 3 + (dx + 1)]
    acc = jnp.clip(acc + b2_ref[...], 0.0, 6.0)                 # (Cm, thw)

    # ---- 1x1 projection conv (BN scale pre-folded) + bias, no activation ----
    out = jnp.dot(w3_ref[...], acc, preferred_element_type=jnp.float32)
    out = out + b3_ref[...]                                     # (Cout, thw)

    if residual:
        out = out + xw[:, W + 1:W + 1 + thw]                    # Cin == Cout

    o_ref[0] = out.astype(o_ref.dtype)


def _pick_tile_h(H, W, cm):
    """Largest row tile whose (Cm, tile) f32 expansion stays well under VMEM."""
    hw = H * W
    budget_lanes = max(128, (4 << 20) // (4 * cm))   # ~4 MiB per (Cm, tile) f32 slab
    if hw <= budget_lanes:
        return H
    for th in range(H, 0, -1):
        if H % th == 0 and th * W <= budget_lanes and (th * W) % 128 == 0:
            return th
    return H


def inverted_residual_block(x_nchw, params, *, residual, tile_h=None):
    """x_nchw: (B, Cin, H, W) float32. Returns (B, Cout, H, W)."""
    B, Cin, H, W = x_nchw.shape
    w1f, b1 = params["w1f"], params["b1"]        # (Cm, Cin), (Cm, 1)
    wdf, b2 = params["wdf"], params["b2"]        # (9, Cm, 1), (Cm, 1)
    w3f, b3 = params["w3f"], params["b3"]        # (Cout, Cm), (Cout, 1)
    Cm, Cout = w1f.shape[0], w3f.shape[0]
    if residual:
        assert Cin == Cout, "residual requires in_planes == out_planes"

    if tile_h is None:
        tile_h = _pick_tile_h(H, W, Cm)
    assert H % tile_h == 0, "tile_h must divide H"
    thw = tile_h * W
    assert thw % 128 == 0 or tile_h == H, \
        "tile_h * W must be a multiple of 128 (or use a single tile)"
    nh = H // tile_h

    HW = H * W
    HWp = HW + 2 * (W + 1)
    # Flatten spatial (free reshape) and add one zero halo row (+1 element) on
    # each side so every in-kernel window slice is in bounds.
    x_pad = jnp.pad(x_nchw.reshape(B, Cin, HW), ((0, 0), (0, 0), (W + 1, W + 1)))

    kernel = functools.partial(_inverted_residual_kernel,
                               H=H, W=W, th=tile_h, residual=residual)

    def build(single_buffer_weights):
        def wspec(shape):
            idx = lambda b, t: (0,) * len(shape)
            if single_buffer_weights:
                return pl.BlockSpec(shape, idx, pipeline_mode=pl.Buffered(1))
            return pl.BlockSpec(shape, idx)

        in_specs = [
            # full padded image, resident across the row-tile axis per batch
            pl.BlockSpec((1, Cin, HWp), lambda b, t: (b, 0, 0)),
            wspec((Cm, Cin)), wspec((Cm, 1)),
            wspec((9, Cm, 1)), wspec((Cm, 1)),
            wspec((Cout, Cm)), wspec((Cout, 1)),
        ]
        return pl.pallas_call(
            kernel,
            out_shape=jax.ShapeDtypeStruct((B, Cout, HW), x_nchw.dtype),
            grid=(B, nh),
            in_specs=in_specs,
            out_specs=pl.BlockSpec((1, Cout, thw), lambda b, t: (b, 0, t)),
            compiler_params=pltpu.CompilerParams(
                dimension_semantics=("parallel", "parallel"),
                vmem_limit_bytes=48 * 1024 * 1024,
            ),
        )

    args = (x_pad, w1f, b1, wdf, b2, w3f, b3)
    try:
        out_flat = build(True)(*args)
    except Exception:
        # pl.Buffered(1) (single-buffered constant weights) unsupported on this
        # jax version -- fall back to default double buffering.
        out_flat = build(False)(*args)

    return out_flat.reshape(B, Cout, H, W)


# ------------------------- parameter construction -------------------------

def _bn_fold(gamma, beta, mean, var, eps=1e-5):
    scale = gamma / jnp.sqrt(var + eps)
    bias = beta - mean * scale
    return scale, bias


def make_params(key, in_planes, out_planes, expansion_factor):
    Cm = in_planes * expansion_factor
    ks = jax.random.split(key, 6)

    # PyTorch-layout conv weights (bias=False everywhere, as in the module).
    w1_t = 0.1 * jax.random.normal(ks[0], (Cm, in_planes, 1, 1), jnp.float32)   # OIHW
    wd_t = 0.1 * jax.random.normal(ks[1], (Cm, 1, 3, 3), jnp.float32)           # depthwise
    w3_t = 0.1 * jax.random.normal(ks[2], (out_planes, Cm, 1, 1), jnp.float32)

    def bn_params(k, c):
        k1, k2, k3, k4 = jax.random.split(k, 4)
        gamma = 1.0 + 0.1 * jax.random.normal(k1, (c,), jnp.float32)
        beta = 0.1 * jax.random.normal(k2, (c,), jnp.float32)
        mean = 0.1 * jax.random.normal(k3, (c,), jnp.float32)
        var = jnp.abs(jax.random.normal(k4, (c,), jnp.float32)) + 0.5
        return gamma, beta, mean, var

    bn1 = bn_params(ks[3], Cm)
    bn2 = bn_params(ks[4], Cm)
    bn3 = bn_params(ks[5], out_planes)

    s1, b1 = _bn_fold(*bn1)
    s2, b2 = _bn_fold(*bn2)
    s3, b3 = _bn_fold(*bn3)

    params = {
        # kernel-layout weights with the BN scale folded in
        "w1f": w1_t[:, :, 0, 0] * s1[:, None],                              # (Cm, Cin)
        "b1": b1.reshape(Cm, 1),
        "wdf": (wd_t[:, 0].reshape(Cm, 9) * s2[:, None]).T.reshape(9, Cm, 1),
        "b2": b2.reshape(Cm, 1),
        "w3f": w3_t[:, :, 0, 0] * s3[:, None],                              # (Cout, Cm)
        "b3": b3.reshape(out_planes, 1),
        # torch-layout copies + raw BN stats for the pure-JAX reference
        "w1_t": w1_t, "wd_t": wd_t, "w3_t": w3_t,
        "bn1": bn1, "bn2": bn2, "bn3": bn3,
    }
    return params


# ----------------------------- pure-JAX reference -----------------------------

def ref_forward(x, params, *, residual):
    eps = 1e-5
    dn = ("NCHW", "OIHW", "NCHW")

    def bn(y, p):
        gamma, beta, mean, var = (a.reshape(1, -1, 1, 1) for a in p)
        return (y - mean) / jnp.sqrt(var + eps) * gamma + beta

    out = jax.lax.conv_general_dilated(x, params["w1_t"], (1, 1), "VALID",
                                       dimension_numbers=dn)
    out = jnp.clip(bn(out, params["bn1"]), 0.0, 6.0)

    Cm = params["wd_t"].shape[0]
    out = jax.lax.conv_general_dilated(out, params["wd_t"], (1, 1),
                                       ((1, 1), (1, 1)),
                                       dimension_numbers=dn,
                                       feature_group_count=Cm)
    out = jnp.clip(bn(out, params["bn2"]), 0.0, 6.0)

    out = jax.lax.conv_general_dilated(out, params["w3_t"], (1, 1), "VALID",
                                       dimension_numbers=dn)
    out = bn(out, params["bn3"])
    if residual:
        out = out + x
    return out


if __name__ == "__main__":
    in_planes, out_planes, expansion_factor, stride = 4, 4, 6, 1
    residual = (in_planes == out_planes) and (stride == 1)

    key = jax.random.PRNGKey(0)
    kx, kp = jax.random.split(key)
    x = jax.random.normal(kx, (2, in_planes, 16, 16), jnp.float32)  # NCHW
    params = make_params(kp, in_planes, out_planes, expansion_factor)

    # tile_h=8 -> grid (B=2, H/8=2): 4 parallel steps, 128-lane output blocks.
    out = inverted_residual_block(x, params, residual=residual, tile_h=8)
    out = jax.block_until_ready(out)

    ref = jax.block_until_ready(ref_forward(x, params, residual=residual))
    assert out.shape == ref.shape == (2, out_planes, 16, 16)
    err = float(jnp.max(jnp.abs(out - ref)))
    assert err < 1e-4, f"mismatch vs reference: {err}"

    print("KERNEL_OK")
</pallas_src>

<mosaic_0001>
module attributes {stable_mosaic.version = 11 : i64} {
  func.func @_inverted_residual_kernel(%arg0: i32, %arg1: i32, %arg2: memref<1x4x290xf32, #tpu.memory_space<vmem>>, %arg3: memref<24x4xf32, #tpu.memory_space<vmem>>, %arg4: memref<24x1xf32, #tpu.memory_space<vmem>>, %arg5: memref<9x24x1xf32, #tpu.memory_space<vmem>>, %arg6: memref<24x1xf32, #tpu.memory_space<vmem>>, %arg7: memref<4x24xf32, #tpu.memory_space<vmem>>, %arg8: memref<4x1xf32, #tpu.memory_space<vmem>>, %arg9: memref<1x4x128xf32, #tpu.memory_space<vmem>>) attributes {dimension_semantics = [#tpu.dimension_semantics<parallel>, #tpu.dimension_semantics<parallel>], iteration_bounds = array<i64: 2, 2>, scalar_prefetch = 0 : i64, scratch_operands = 0 : i64, tpu.core_type = #tpu.core_type<tc>, window_params = [{transform_indices = @transform_0, window_bounds = array<i64: 1, 4, 290>}, {pipeline_mode = #tpu.pipeline_mode<synchronous>, transform_indices = @transform_1, window_bounds = array<i64: 24, 4>}, {pipeline_mode = #tpu.pipeline_mode<synchronous>, transform_indices = @transform_2, window_bounds = array<i64: 24, 1>}, {pipeline_mode = #tpu.pipeline_mode<synchronous>, transform_indices = @transform_3, window_bounds = array<i64: 9, 24, 1>}, {pipeline_mode = #tpu.pipeline_mode<synchronous>, transform_indices = @transform_4, window_bounds = array<i64: 24, 1>}, {pipeline_mode = #tpu.pipeline_mode<synchronous>, transform_indices = @transform_5, window_bounds = array<i64: 4, 24>}, {pipeline_mode = #tpu.pipeline_mode<synchronous>, transform_indices = @transform_6, window_bounds = array<i64: 4, 1>}, {transform_indices = @transform_7, window_bounds = array<i64: 1, 4, 128>}]} {
    %c128_i32 = arith.constant 128 : i32
    %0 = arith.muli %arg1, %c128_i32 : i32
    %1 = tpu.assume_multiple %0, 128 : i32
    %c0 = arith.constant 0 : index
    %c0_0 = arith.constant 0 : index
    %2 = arith.index_cast %1 : i32 to index
    %3 = vector.load %arg2[%c0, %c0_0, %2] : memref<1x4x290xf32, #tpu.memory_space<vmem>>, vector<1x4x162xf32>
    %4 = vector.shape_cast %3 : vector<1x4x162xf32> to vector<4x162xf32>
    %c0_1 = arith.constant 0 : index
    %c0_2 = arith.constant 0 : index
    %5 = vector.load %arg3[%c0_1, %c0_2] : memref<24x4xf32, #tpu.memory_space<vmem>>, vector<24x1xf32>
    %6 = vector.extract_strided_slice %4 {offsets = [0, 0], sizes = [1, 162], strides = [1, 1]} : vector<4x162xf32> to vector<1x162xf32>
    %7 = vector.broadcast %5 : vector<24x1xf32> to vector<24x162xf32>
    %8 = vector.broadcast %6 : vector<1x162xf32> to vector<24x162xf32>
    %9 = arith.mulf %7, %8 : vector<24x162xf32>
    %c0_3 = arith.constant 0 : index
    %c1 = arith.constant 1 : index
    %10 = vector.load %arg3[%c0_3, %c1] : memref<24x4xf32, #tpu.memory_space<vmem>>, vector<24x1xf32>
    %11 = vector.extract_strided_slice %4 {offsets = [1, 0], sizes = [1, 162], strides = [1, 1]} : vector<4x162xf32> to vector<1x162xf32>
    %12 = vector.broadcast %10 : vector<24x1xf32> to vector<24x162xf32>
    %13 = vector.broadcast %11 : vector<1x162xf32> to vector<24x162xf32>
    %14 = arith.mulf %12, %13 : vector<24x162xf32>
    %15 = arith.addf %9, %14 : vector<24x162xf32>
    %c0_4 = arith.constant 0 : index
    %c2 = arith.constant 2 : index
    %16 = vector.load %arg3[%c0_4, %c2] : memref<24x4xf32, #tpu.memory_space<vmem>>, vector<24x1xf32>
    %17 = vector.extract_strided_slice %4 {offsets = [2, 0], sizes = [1, 162], strides = [1, 1]} : vector<4x162xf32> to vector<1x162xf32>
    %18 = vector.broadcast %16 : vector<24x1xf32> to vector<24x162xf32>
    %19 = vector.broadcast %17 : vector<1x162xf32> to vector<24x162xf32>
    %20 = arith.mulf %18, %19 : vector<24x162xf32>
    %21 = arith.addf %15, %20 : vector<24x162xf32>
    %c0_5 = arith.constant 0 : index
    %c3 = arith.constant 3 : index
    %22 = vector.load %arg3[%c0_5, %c3] : memref<24x4xf32, #tpu.memory_space<vmem>>, vector<24x1xf32>
    %23 = vector.extract_strided_slice %4 {offsets = [3, 0], sizes = [1, 162], strides = [1, 1]} : vector<4x162xf32> to vector<1x162xf32>
    %24 = vector.broadcast %22 : vector<24x1xf32> to vector<24x162xf32>
    %25 = vector.broadcast %23 : vector<1x162xf32> to vector<24x162xf32>
    %26 = arith.mulf %24, %25 : vector<24x162xf32>
    %27 = arith.addf %21, %26 : vector<24x162xf32>
    %c0_6 = arith.constant 0 : index
    %c0_7 = arith.constant 0 : index
    %28 = vector.load %arg4[%c0_6, %c0_7] : memref<24x1xf32, #tpu.memory_space<vmem>>, vector<24x1xf32>
    %29 = vector.broadcast %28 : vector<24x1xf32> to vector<24x162xf32>
    %30 = arith.addf %27, %29 : vector<24x162xf32>
    %cst = arith.constant 0.000000e+00 : f32
    %cst_8 = arith.constant 6.000000e+00 : f32
    %31 = vector.broadcast %cst : f32 to vector<24x162xf32>
    %32 = arith.maximumf %31, %30 : vector<24x162xf32>
    %33 = vector.broadcast %cst_8 : f32 to vector<24x162xf32>
    %34 = arith.minimumf %33, %32 : vector<24x162xf32>
    %35 = tpu.iota {dimensions = array<i32: 1>} : vector<1x162xi32>
    %36 = vector.broadcast %1 : i32 to vector<1x162xi32>
    %37 = arith.addi %36, %35 : vector<1x162xi32>
    %c17_i32 = arith.constant 17 : i32
    %38 = vector.broadcast %c17_i32 : i32 to vector<1x162xi32>
    %39 = arith.subi %37, %38 : vector<1x162xi32>
    %c0_i32 = arith.constant 0 : i32
    %40 = vector.broadcast %c0_i32 : i32 to vector<1x162xi32>
    %41 = arith.cmpi sge, %39, %40 : vector<1x162xi32>
    %c256_i32 = arith.constant 256 : i32
    %42 = vector.broadcast %c256_i32 : i32 to vector<1x162xi32>
    %43 = arith.cmpi slt, %39, %42 : vector<1x162xi32>
    %44 = arith.andi %41, %43 : vector<1x162xi1>
    %cst_9 = arith.constant 0.000000e+00 : f32
    %45 = vector.shape_cast %44 : vector<1x162xi1> to vector<1x162xi1>
    %46 = vector.broadcast %45 : vector<1x162xi1> to vector<24x162xi1>
    %47 = vector.broadcast %cst_9 : f32 to vector<24x162xf32>
    %48 = arith.select %46, %34, %47 : vector<24x162xi1>, vector<24x162xf32>
    %49 = tpu.iota {dimensions = array<i32: 1>} : vector<1x128xi32>
    %c16_i32 = arith.constant 16 : i32
    %c0_i32_10 = arith.constant 0 : i32
    %50 = arith.cmpi eq, %c16_i32, %c0_i32_10 : i32
    %c1_i32 = arith.constant 1 : i32
    %51 = arith.select %50, %c1_i32, %c16_i32 : i32
    %52 = vector.broadcast %51 : i32 to vector<1x128xi32>
    %53 = arith.remsi %49, %52 : vector<1x128xi32>
    %c0_i32_11 = arith.constant 0 : i32
    %54 = vector.broadcast %c0_i32_11 : i32 to vector<1x128xi32>
    %55 = arith.cmpi ne, %53, %54 : vector<1x128xi32>
    %c0_i32_12 = arith.constant 0 : i32
    %56 = vector.broadcast %c0_i32_12 : i32 to vector<1x128xi32>
    %57 = arith.cmpi slt, %53, %56 : vector<1x128xi32>
    %c0_i32_13 = arith.constant 0 : i32
    %58 = arith.cmpi slt, %51, %c0_i32_13 : i32
    %59 = vector.broadcast %58 : i1 to vector<1x128xi1>
    %60 = vector.broadcast %59 : vector<1x128xi1> to vector<1x128xi1>
    %61 = arith.xori %57, %60 : vector<1x128xi1>
    %62 = arith.andi %61, %55 : vector<1x128xi1>
    %63 = vector.broadcast %51 : i32 to vector<1x128xi32>
    %64 = arith.addi %53, %63 : vector<1x128xi32>
    %65 = arith.select %62, %64, %53 : vector<1x128xi1>, vector<1x128xi32>
    %c0_i32_14 = arith.constant 0 : i32
    %66 = vector.broadcast %c0_i32_14 : i32 to vector<1x128xi32>
    %67 = arith.cmpi sgt, %65, %66 : vector<1x128xi32>
    %c15_i32 = arith.constant 15 : i32
    %68 = vector.broadcast %c15_i32 : i32 to vector<1x128xi32>
    %69 = arith.cmpi slt, %65, %68 : vector<1x128xi32>
    %cst_15 = arith.constant 0.000000e+00 : f32
    %70 = vector.broadcast %cst_15 : f32 to vector<24x128xf32>
    %71 = vector.extract_strided_slice %48 {offsets = [0, 0], sizes = [24, 128], strides = [1, 1]} : vector<24x162xf32> to vector<24x128xf32>
    %cst_16 = arith.constant 0.000000e+00 : f32
    %72 = vector.shape_cast %67 : vector<1x128xi1> to vector<1x128xi1>
    %73 = vector.broadcast %72 : vector<1x128xi1> to vector<24x128xi1>
    %74 = vector.broadcast %cst_16 : f32 to vector<24x128xf32>
    %75 = arith.select %73, %71, %74 : vector<24x128xi1>, vector<24x128xf32>
    %c0_17 = arith.constant 0 : index
    %c0_18 = arith.constant 0 : index
    %c0_19 = arith.constant 0 : index
    %76 = vector.load %arg5[%c0_17, %c0_18, %c0_19] : memref<9x24x1xf32, #tpu.memory_space<vmem>>, vector<1x24x1xf32>
    %77 = vector.shape_cast %76 : vector<1x24x1xf32> to vector<24x1xf32>
    %78 = vector.broadcast %77 : vector<24x1xf32> to vector<24x128xf32>
    %79 = arith.mulf %75, %78 : vector<24x128xf32>
    %80 = arith.addf %70, %79 : vector<24x128xf32>
    %81 = vector.extract_strided_slice %48 {offsets = [0, 1], sizes = [24, 128], strides = [1, 1]} : vector<24x162xf32> to vector<24x128xf32>
    %c1_20 = arith.constant 1 : index
    %c0_21 = arith.constant 0 : index
    %c0_22 = arith.constant 0 : index
    %82 = vector.load %arg5[%c1_20, %c0_21, %c0_22] : memref<9x24x1xf32, #tpu.memory_space<vmem>>, vector<1x24x1xf32>
    %83 = vector.shape_cast %82 : vector<1x24x1xf32> to vector<24x1xf32>
    %84 = vector.broadcast %83 : vector<24x1xf32> to vector<24x128xf32>
    %85 = arith.mulf %81, %84 : vector<24x128xf32>
    %86 = arith.addf %80, %85 : vector<24x128xf32>
    %87 = vector.extract_strided_slice %48 {offsets = [0, 2], sizes = [24, 128], strides = [1, 1]} : vector<24x162xf32> to vector<24x128xf32>
    %cst_23 = arith.constant 0.000000e+00 : f32
    %88 = vector.shape_cast %69 : vector<1x128xi1> to vector<1x128xi1>
    %89 = vector.broadcast %88 : vector<1x128xi1> to vector<24x128xi1>
    %90 = vector.broadcast %cst_23 : f32 to vector<24x128xf32>
    %91 = arith.select %89, %87, %90 : vector<24x128xi1>, vector<24x128xf32>
    %c2_24 = arith.constant 2 : index
    %c0_25 = arith.constant 0 : index
    %c0_26 = arith.constant 0 : index
    %92 = vector.load %arg5[%c2_24, %c0_25, %c0_26] : memref<9x24x1xf32, #tpu.memory_space<vmem>>, vector<1x24x1xf32>
    %93 = vector.shape_cast %92 : vector<1x24x1xf32> to vector<24x1xf32>
    %94 = vector.broadcast %93 : vector<24x1xf32> to vector<24x128xf32>
    %95 = arith.mulf %91, %94 : vector<24x128xf32>
    %96 = arith.addf %86, %95 : vector<24x128xf32>
    %97 = vector.extract_strided_slice %48 {offsets = [0, 16], sizes = [24, 128], strides = [1, 1]} : vector<24x162xf32> to vector<24x128xf32>
    %cst_27 = arith.constant 0.000000e+00 : f32
    %98 = vector.shape_cast %67 : vector<1x128xi1> to vector<1x128xi1>
    %99 = vector.broadcast %98 : vector<1x128xi1> to vector<24x128xi1>
    %100 = vector.broadcast %cst_27 : f32 to vector<24x128xf32>
    %101 = arith.select %99, %97, %100 : vector<24x128xi1>, vector<24x128xf32>
    %c3_28 = arith.constant 3 : index
    %c0_29 = arith.constant 0 : index
    %c0_30 = arith.constant 0 : index
    %102 = vector.load %arg5[%c3_28, %c0_29, %c0_30] : memref<9x24x1xf32, #tpu.memory_space<vmem>>, vector<1x24x1xf32>
    %103 = vector.shape_cast %102 : vector<1x24x1xf32> to vector<24x1xf32>
    %104 = vector.broadcast %103 : vector<24x1xf32> to vector<24x128xf32>
    %105 = arith.mulf %101, %104 : vector<24x128xf32>
    %106 = arith.addf %96, %105 : vector<24x128xf32>
    %107 = vector.extract_strided_slice %48 {offsets = [0, 17], sizes = [24, 128], strides = [1, 1]} : vector<24x162xf32> to vector<24x128xf32>
    %c4 = arith.constant 4 : index
    %c0_31 = arith.constant 0 : index
    %c0_32 = arith.constant 0 : index
    %108 = vector.load %arg5[%c4, %c0_31, %c0_32] : memref<9x24x1xf32, #tpu.memory_space<vmem>>, vector<1x24x1xf32>
    %109 = vector.shape_cast %108 : vector<1x24x1xf32> to vector<24x1xf32>
    %110 = vector.broadcast %109 : vector<24x1xf32> to vector<24x128xf32>
    %111 = arith.mulf %107, %110 : vector<24x128xf32>
    %112 = arith.addf %106, %111 : vector<24x128xf32>
    %113 = vector.extract_strided_slice %48 {offsets = [0, 18], sizes = [24, 128], strides = [1, 1]} : vector<24x162xf32> to vector<24x128xf32>
    %cst_33 = arith.constant 0.000000e+00 : f32
    %114 = vector.shape_cast %69 : vector<1x128xi1> to vector<1x128xi1>
    %115 = vector.broadcast %114 : vector<1x128xi1> to vector<24x128xi1>
    %116 = vector.broadcast %cst_33 : f32 to vector<24x128xf32>
    %117 = arith.select %115, %113, %116 : vector<24x128xi1>, vector<24x128xf32>
    %c5 = arith.constant 5 : index
    %c0_34 = arith.constant 0 : index
    %c0_35 = arith.constant 0 : index
    %118 = vector.load %arg5[%c5, %c0_34, %c0_35] : memref<9x24x1xf32, #tpu.memory_space<vmem>>, vector<1x24x1xf32>
    %119 = vector.shape_cast %118 : vector<1x24x1xf32> to vector<24x1xf32>
    %120 = vector.broadcast %119 : vector<24x1xf32> to vector<24x128xf32>
    %121 = arith.mulf %117, %120 : vector<24x128xf32>
    %122 = arith.addf %112, %121 : vector<24x128xf32>
    %123 = vector.extract_strided_slice %48 {offsets = [0, 32], sizes = [24, 128], strides = [1, 1]} : vector<24x162xf32> to vector<24x128xf32>
    %cst_36 = arith.constant 0.000000e+00 : f32
    %124 = vector.shape_cast %67 : vector<1x128xi1> to vector<1x128xi1>
    %125 = vector.broadcast %124 : vector<1x128xi1> to vector<24x128xi1>
    %126 = vector.broadcast %cst_36 : f32 to vector<24x128xf32>
    %127 = arith.select %125, %123, %126 : vector<24x128xi1>, vector<24x128xf32>
    %c6 = arith.constant 6 : index
    %c0_37 = arith.constant 0 : index
    %c0_38 = arith.constant 0 : index
    %128 = vector.load %arg5[%c6, %c0_37, %c0_38] : memref<9x24x1xf32, #tpu.memory_space<vmem>>, vector<1x24x1xf32>
    %129 = vector.shape_cast %128 : vector<1x24x1xf32> to vector<24x1xf32>
    %130 = vector.broadcast %129 : vector<24x1xf32> to vector<24x128xf32>
    %131 = arith.mulf %127, %130 : vector<24x128xf32>
    %132 = arith.addf %122, %131 : vector<24x128xf32>
    %133 = vector.extract_strided_slice %48 {offsets = [0, 33], sizes = [24, 128], strides = [1, 1]} : vector<24x162xf32> to vector<24x128xf32>
    %c7 = arith.constant 7 : index
    %c0_39 = arith.constant 0 : index
    %c0_40 = arith.constant 0 : index
    %134 = vector.load %arg5[%c7, %c0_39, %c0_40] : memref<9x24x1xf32, #tpu.memory_space<vmem>>, vector<1x24x1xf32>
    %135 = vector.shape_cast %134 : vector<1x24x1xf32> to vector<24x1xf32>
    %136 = vector.broadcast %135 : vector<24x1xf32> to vector<24x128xf32>
    %137 = arith.mulf %133, %136 : vector<24x128xf32>
    %138 = arith.addf %132, %137 : vector<24x128xf32>
    %139 = vector.extract_strided_slice %48 {offsets = [0, 34], sizes = [24, 128], strides = [1, 1]} : vector<24x162xf32> to vector<24x128xf32>
    %cst_41 = arith.constant 0.000000e+00 : f32
    %140 = vector.shape_cast %69 : vector<1x128xi1> to vector<1x128xi1>
    %141 = vector.broadcast %140 : vector<1x128xi1> to vector<24x128xi1>
    %142 = vector.broadcast %cst_41 : f32 to vector<24x128xf32>
    %143 = arith.select %141, %139, %142 : vector<24x128xi1>, vector<24x128xf32>
    %c8 = arith.constant 8 : index
    %c0_42 = arith.constant 0 : index
    %c0_43 = arith.constant 0 : index
    %144 = vector.load %arg5[%c8, %c0_42, %c0_43] : memref<9x24x1xf32, #tpu.memory_space<vmem>>, vector<1x24x1xf32>
    %145 = vector.shape_cast %144 : vector<1x24x1xf32> to vector<24x1xf32>
    %146 = vector.broadcast %145 : vector<24x1xf32> to vector<24x128xf32>
    %147 = arith.mulf %143, %146 : vector<24x128xf32>
    %148 = arith.addf %138, %147 : vector<24x128xf32>
    %c0_44 = arith.constant 0 : index
    %c0_45 = arith.constant 0 : index
    %149 = vector.load %arg6[%c0_44, %c0_45] : memref<24x1xf32, #tpu.memory_space<vmem>>, vector<24x1xf32>
    %150 = vector.broadcast %149 : vector<24x1xf32> to vector<24x128xf32>
    %151 = arith.addf %148, %150 : vector<24x128xf32>
    %cst_46 = arith.constant 0.000000e+00 : f32
    %cst_47 = arith.constant 6.000000e+00 : f32
    %152 = vector.broadcast %cst_46 : f32 to vector<24x128xf32>
    %153 = arith.maximumf %152, %151 : vector<24x128xf32>
    %154 = vector.broadcast %cst_47 : f32 to vector<24x128xf32>
    %155 = arith.minimumf %154, %153 : vector<24x128xf32>
    %c0_48 = arith.constant 0 : index
    %c0_49 = arith.constant 0 : index
    %156 = vector.load %arg7[%c0_48, %c0_49] : memref<4x24xf32, #tpu.memory_space<vmem>>, vector<4x24xf32>
    %cst_50 = arith.constant dense<0.000000e+00> : vector<4x128xf32>
    %157 = tpu.matmul %156, %155, %cst_50 {dimension_numbers = #tpu.dot_dimension_numbers<[1], [0], [0], [1], [0, 0, 1, 1], [], []>} : vector<4x24xf32>, vector<24x128xf32>, vector<4x128xf32> -> vector<4x128xf32>
    %c0_51 = arith.constant 0 : index
    %c0_52 = arith.constant 0 : index
    %158 = vector.load %arg8[%c0_51, %c0_52] : memref<4x1xf32, #tpu.memory_space<vmem>>, vector<4x1xf32>
    %159 = vector.broadcast %158 : vector<4x1xf32> to vector<4x128xf32>
    %160 = arith.addf %157, %159 : vector<4x128xf32>
    %161 = vector.extract_strided_slice %4 {offsets = [0, 17], sizes = [4, 128], strides = [1, 1]} : vector<4x162xf32> to vector<4x128xf32>
    %162 = arith.addf %160, %161 : vector<4x128xf32>
    %c0_53 = arith.constant 0 : index
    %c0_54 = arith.constant 0 : index
    %c0_55 = arith.constant 0 : index
    %163 = vector.load %arg9[%c0_53, %c0_54, %c0_55] : memref<1x4x128xf32, #tpu.memory_space<vmem>>, vector<1x4x128xf32>
    %164 = vector.shape_cast %163 : vector<1x4x128xf32> to vector<4x128xf32>
    %165 = vector.shape_cast %162 : vector<4x128xf32> to vector<1x4x128xf32>
    tpu.vector_store %arg9[%c0_53, %c0_54, %c0_55], %165 {strides = array<i32>} : memref<1x4x128xf32, #tpu.memory_space<vmem>>, vector<1x4x128xf32>,
    return
  }
  func.func @transform_0(%arg0: i32, %arg1: i32) -> (i32, i32, i32) {
    %c0_i32 = arith.constant 0 : i32
    %c0_i32_0 = arith.constant 0 : i32
    %c0_i32_1 = arith.constant 0 : i32
    return %arg0, %c0_i32, %c0_i32_0 : i32, i32, i32
  }
  func.func @transform_1(%arg0: i32, %arg1: i32) -> (i32, i32) {
    %c0_i32 = arith.constant 0 : i32
    %c0_i32_0 = arith.constant 0 : i32
    %c0_i32_1 = arith.constant 0 : i32
    return %c0_i32, %c0_i32_0 : i32, i32
  }
  func.func @transform_2(%arg0: i32, %arg1: i32) -> (i32, i32) {
    %c0_i32 = arith.constant 0 : i32
    %c0_i32_0 = arith.constant 0 : i32
    %c0_i32_1 = arith.constant 0 : i32
    return %c0_i32, %c0_i32_0 : i32, i32
  }
  func.func @transform_3(%arg0: i32, %arg1: i32) -> (i32, i32, i32) {
    %c0_i32 = arith.constant 0 : i32
    %c0_i32_0 = arith.constant 0 : i32
    %c0_i32_1 = arith.constant 0 : i32
    %c0_i32_2 = arith.constant 0 : i32
    return %c0_i32, %c0_i32_0, %c0_i32_1 : i32, i32, i32
  }
  func.func @transform_4(%arg0: i32, %arg1: i32) -> (i32, i32) {
    %c0_i32 = arith.constant 0 : i32
    %c0_i32_0 = arith.constant 0 : i32
    %c0_i32_1 = arith.constant 0 : i32
    return %c0_i32, %c0_i32_0 : i32, i32
  }
  func.func @transform_5(%arg0: i32, %arg1: i32) -> (i32, i32) {
    %c0_i32 = arith.constant 0 : i32
    %c0_i32_0 = arith.constant 0 : i32
    %c0_i32_1 = arith.constant 0 : i32
    return %c0_i32, %c0_i32_0 : i32, i32
  }
  func.func @transform_6(%arg0: i32, %arg1: i32) -> (i32, i32) {
    %c0_i32 = arith.constant 0 : i32
    %c0_i32_0 = arith.constant 0 : i32
    %c0_i32_1 = arith.constant 0 : i32
    return %c0_i32, %c0_i32_0 : i32, i32
  }
  func.func @transform_7(%arg0: i32, %arg1: i32) -> (i32, i32, i32) {
    %c0_i32 = arith.constant 0 : i32
    %c0_i32_0 = arith.constant 0 : i32
    return %arg0, %c0_i32, %arg1 : i32, i32, i32
  }
}

module attributes {stable_mosaic.version = 11 : i64} {
  func.func @_inverted_residual_kernel(%arg0: i32, %arg1: i32, %arg2: memref<1x4x290xf32, #tpu.memory_space<vmem>>, %arg3: memref<24x4xf32, #tpu.memory_space<vmem>>, %arg4: memref<24x1xf32, #tpu.memory_space<vmem>>, %arg5: memref<9x24x1xf32, #tpu.memory_space<vmem>>, %arg6: memref<24x1xf32, #tpu.memory_space<vmem>>, %arg7: memref<4x24xf32, #tpu.memory_space<vmem>>, %arg8: memref<4x1xf32, #tpu.memory_space<vmem>>, %arg9: memref<1x4x128xf32, #tpu.memory_space<vmem>>) attributes {dimension_semantics = [#tpu.dimension_semantics<parallel>, #tpu.dimension_semantics<parallel>], iteration_bounds = array<i64: 2, 2>, scalar_prefetch = 0 : i64, scratch_operands = 0 : i64, tpu.core_type = #tpu.core_type<tc>, window_params = [{transform_indices = @transform_0, window_bounds = array<i64: 1, 4, 290>}, {pipeline_mode = #tpu.pipeline_mode<synchronous>, transform_indices = @transform_1, window_bounds = array<i64: 24, 4>}, {pipeline_mode = #tpu.pipeline_mode<synchronous>, transform_indices = @transform_2, window_bounds = array<i64: 24, 1>}, {pipeline_mode = #tpu.pipeline_mode<synchronous>, transform_indices = @transform_3, window_bounds = array<i64: 9, 24, 1>}, {pipeline_mode = #tpu.pipeline_mode<synchronous>, transform_indices = @transform_4, window_bounds = array<i64: 24, 1>}, {pipeline_mode = #tpu.pipeline_mode<synchronous>, transform_indices = @transform_5, window_bounds = array<i64: 4, 24>}, {pipeline_mode = #tpu.pipeline_mode<synchronous>, transform_indices = @transform_6, window_bounds = array<i64: 4, 1>}, {transform_indices = @transform_7, window_bounds = array<i64: 1, 4, 128>}]} {
    %c128_i32 = arith.constant 128 : i32
    %0 = arith.muli %arg1, %c128_i32 : i32
    %1 = tpu.assume_multiple %0, 128 : i32
    %c0 = arith.constant 0 : index
    %c0_0 = arith.constant 0 : index
    %2 = arith.index_cast %1 : i32 to index
    %3 = vector.load %arg2[%c0, %c0_0, %2] : memref<1x4x290xf32, #tpu.memory_space<vmem>>, vector<1x4x162xf32>
    %4 = vector.shape_cast %3 : vector<1x4x162xf32> to vector<4x162xf32>
    %c0_1 = arith.constant 0 : index
    %c0_2 = arith.constant 0 : index
    %5 = vector.load %arg3[%c0_1, %c0_2] : memref<24x4xf32, #tpu.memory_space<vmem>>, vector<24x1xf32>
    %6 = vector.extract_strided_slice %4 {offsets = [0, 0], sizes = [1, 162], strides = [1, 1]} : vector<4x162xf32> to vector<1x162xf32>
    %7 = vector.broadcast %5 : vector<24x1xf32> to vector<24x162xf32>
    %8 = vector.broadcast %6 : vector<1x162xf32> to vector<24x162xf32>
    %9 = arith.mulf %7, %8 : vector<24x162xf32>
    %c0_3 = arith.constant 0 : index
    %c1 = arith.constant 1 : index
    %10 = vector.load %arg3[%c0_3, %c1] : memref<24x4xf32, #tpu.memory_space<vmem>>, vector<24x1xf32>
    %11 = vector.extract_strided_slice %4 {offsets = [1, 0], sizes = [1, 162], strides = [1, 1]} : vector<4x162xf32> to vector<1x162xf32>
    %12 = vector.broadcast %10 : vector<24x1xf32> to vector<24x162xf32>
    %13 = vector.broadcast %11 : vector<1x162xf32> to vector<24x162xf32>
    %14 = arith.mulf %12, %13 : vector<24x162xf32>
    %15 = arith.addf %9, %14 : vector<24x162xf32>
    %c0_4 = arith.constant 0 : index
    %c2 = arith.constant 2 : index
    %16 = vector.load %arg3[%c0_4, %c2] : memref<24x4xf32, #tpu.memory_space<vmem>>, vector<24x1xf32>
    %17 = vector.extract_strided_slice %4 {offsets = [2, 0], sizes = [1, 162], strides = [1, 1]} : vector<4x162xf32> to vector<1x162xf32>
    %18 = vector.broadcast %16 : vector<24x1xf32> to vector<24x162xf32>
    %19 = vector.broadcast %17 : vector<1x162xf32> to vector<24x162xf32>
    %20 = arith.mulf %18, %19 : vector<24x162xf32>
    %21 = arith.addf %15, %20 : vector<24x162xf32>
    %c0_5 = arith.constant 0 : index
    %c3 = arith.constant 3 : index
    %22 = vector.load %arg3[%c0_5, %c3] : memref<24x4xf32, #tpu.memory_space<vmem>>, vector<24x1xf32>
    %23 = vector.extract_strided_slice %4 {offsets = [3, 0], sizes = [1, 162], strides = [1, 1]} : vector<4x162xf32> to vector<1x162xf32>
    %24 = vector.broadcast %22 : vector<24x1xf32> to vector<24x162xf32>
    %25 = vector.broadcast %23 : vector<1x162xf32> to vector<24x162xf32>
    %26 = arith.mulf %24, %25 : vector<24x162xf32>
    %27 = arith.addf %21, %26 : vector<24x162xf32>
    %c0_6 = arith.constant 0 : index
    %c0_7 = arith.constant 0 : index
    %28 = vector.load %arg4[%c0_6, %c0_7] : memref<24x1xf32, #tpu.memory_space<vmem>>, vector<24x1xf32>
    %29 = vector.broadcast %28 : vector<24x1xf32> to vector<24x162xf32>
    %30 = arith.addf %27, %29 : vector<24x162xf32>
    %cst = arith.constant 0.000000e+00 : f32
    %cst_8 = arith.constant 6.000000e+00 : f32
    %31 = vector.broadcast %cst : f32 to vector<24x162xf32>
    %32 = arith.maximumf %31, %30 : vector<24x162xf32>
    %33 = vector.broadcast %cst_8 : f32 to vector<24x162xf32>
    %34 = arith.minimumf %33, %32 : vector<24x162xf32>
    %35 = tpu.iota {dimensions = array<i32: 1>} : vector<1x162xi32>
    %36 = vector.broadcast %1 : i32 to vector<1x162xi32>
    %37 = arith.addi %36, %35 : vector<1x162xi32>
    %c17_i32 = arith.constant 17 : i32
    %38 = vector.broadcast %c17_i32 : i32 to vector<1x162xi32>
    %39 = arith.subi %37, %38 : vector<1x162xi32>
    %c0_i32 = arith.constant 0 : i32
    %40 = vector.broadcast %c0_i32 : i32 to vector<1x162xi32>
    %41 = arith.cmpi sge, %39, %40 : vector<1x162xi32>
    %c256_i32 = arith.constant 256 : i32
    %42 = vector.broadcast %c256_i32 : i32 to vector<1x162xi32>
    %43 = arith.cmpi slt, %39, %42 : vector<1x162xi32>
    %44 = arith.andi %41, %43 : vector<1x162xi1>
    %cst_9 = arith.constant 0.000000e+00 : f32
    %45 = vector.shape_cast %44 : vector<1x162xi1> to vector<1x162xi1>
    %46 = vector.broadcast %45 : vector<1x162xi1> to vector<24x162xi1>
    %47 = vector.broadcast %cst_9 : f32 to vector<24x162xf32>
    %48 = arith.select %46, %34, %47 : vector<24x162xi1>, vector<24x162xf32>
    %49 = tpu.iota {dimensions = array<i32: 1>} : vector<1x128xi32>
    %c16_i32 = arith.constant 16 : i32
    %c0_i32_10 = arith.constant 0 : i32
    %50 = arith.cmpi eq, %c16_i32, %c0_i32_10 : i32
    %c1_i32 = arith.constant 1 : i32
    %51 = arith.select %50, %c1_i32, %c16_i32 : i32
    %52 = vector.broadcast %51 : i32 to vector<1x128xi32>
    %53 = arith.remsi %49, %52 : vector<1x128xi32>
    %c0_i32_11 = arith.constant 0 : i32
    %54 = vector.broadcast %c0_i32_11 : i32 to vector<1x128xi32>
    %55 = arith.cmpi ne, %53, %54 : vector<1x128xi32>
    %c0_i32_12 = arith.constant 0 : i32
    %56 = vector.broadcast %c0_i32_12 : i32 to vector<1x128xi32>
    %57 = arith.cmpi slt, %53, %56 : vector<1x128xi32>
    %c0_i32_13 = arith.constant 0 : i32
    %58 = arith.cmpi slt, %51, %c0_i32_13 : i32
    %59 = vector.broadcast %58 : i1 to vector<1x128xi1>
    %60 = vector.broadcast %59 : vector<1x128xi1> to vector<1x128xi1>
    %61 = arith.xori %57, %60 : vector<1x128xi1>
    %62 = arith.andi %61, %55 : vector<1x128xi1>
    %63 = vector.broadcast %51 : i32 to vector<1x128xi32>
    %64 = arith.addi %53, %63 : vector<1x128xi32>
    %65 = arith.select %62, %64, %53 : vector<1x128xi1>, vector<1x128xi32>
    %c0_i32_14 = arith.constant 0 : i32
    %66 = vector.broadcast %c0_i32_14 : i32 to vector<1x128xi32>
    %67 = arith.cmpi sgt, %65, %66 : vector<1x128xi32>
    %c15_i32 = arith.constant 15 : i32
    %68 = vector.broadcast %c15_i32 : i32 to vector<1x128xi32>
    %69 = arith.cmpi slt, %65, %68 : vector<1x128xi32>
    %cst_15 = arith.constant 0.000000e+00 : f32
    %70 = vector.broadcast %cst_15 : f32 to vector<24x128xf32>
    %71 = vector.extract_strided_slice %48 {offsets = [0, 0], sizes = [24, 128], strides = [1, 1]} : vector<24x162xf32> to vector<24x128xf32>
    %cst_16 = arith.constant 0.000000e+00 : f32
    %72 = vector.shape_cast %67 : vector<1x128xi1> to vector<1x128xi1>
    %73 = vector.broadcast %72 : vector<1x128xi1> to vector<24x128xi1>
    %74 = vector.broadcast %cst_16 : f32 to vector<24x128xf32>
    %75 = arith.select %73, %71, %74 : vector<24x128xi1>, vector<24x128xf32>
    %c0_17 = arith.constant 0 : index
    %c0_18 = arith.constant 0 : index
    %c0_19 = arith.constant 0 : index
    %76 = vector.load %arg5[%c0_17, %c0_18, %c0_19] : memref<9x24x1xf32, #tpu.memory_space<vmem>>, vector<1x24x1xf32>
    %77 = vector.shape_cast %76 : vector<1x24x1xf32> to vector<24x1xf32>
    %78 = vector.broadcast %77 : vector<24x1xf32> to vector<24x128xf32>
    %79 = arith.mulf %75, %78 : vector<24x128xf32>
    %80 = arith.addf %70, %79 : vector<24x128xf32>
    %81 = vector.extract_strided_slice %48 {offsets = [0, 1], sizes = [24, 128], strides = [1, 1]} : vector<24x162xf32> to vector<24x128xf32>
    %c1_20 = arith.constant 1 : index
    %c0_21 = arith.constant 0 : index
    %c0_22 = arith.constant 0 : index
    %82 = vector.load %arg5[%c1_20, %c0_21, %c0_22] : memref<9x24x1xf32, #tpu.memory_space<vmem>>, vector<1x24x1xf32>
    %83 = vector.shape_cast %82 : vector<1x24x1xf32> to vector<24x1xf32>
    %84 = vector.broadcast %83 : vector<24x1xf32> to vector<24x128xf32>
    %85 = arith.mulf %81, %84 : vector<24x128xf32>
    %86 = arith.addf %80, %85 : vector<24x128xf32>
    %87 = vector.extract_strided_slice %48 {offsets = [0, 2], sizes = [24, 128], strides = [1, 1]} : vector<24x162xf32> to vector<24x128xf32>
    %cst_23 = arith.constant 0.000000e+00 : f32
    %88 = vector.shape_cast %69 : vector<1x128xi1> to vector<1x128xi1>
    %89 = vector.broadcast %88 : vector<1x128xi1> to vector<24x128xi1>
    %90 = vector.broadcast %cst_23 : f32 to vector<24x128xf32>
    %91 = arith.select %89, %87, %90 : vector<24x128xi1>, vector<24x128xf32>
    %c2_24 = arith.constant 2 : index
    %c0_25 = arith.constant 0 : index
    %c0_26 = arith.constant 0 : index
    %92 = vector.load %arg5[%c2_24, %c0_25, %c0_26] : memref<9x24x1xf32, #tpu.memory_space<vmem>>, vector<1x24x1xf32>
    %93 = vector.shape_cast %92 : vector<1x24x1xf32> to vector<24x1xf32>
    %94 = vector.broadcast %93 : vector<24x1xf32> to vector<24x128xf32>
    %95 = arith.mulf %91, %94 : vector<24x128xf32>
    %96 = arith.addf %86, %95 : vector<24x128xf32>
    %97 = vector.extract_strided_slice %48 {offsets = [0, 16], sizes = [24, 128], strides = [1, 1]} : vector<24x162xf32> to vector<24x128xf32>
    %cst_27 = arith.constant 0.000000e+00 : f32
    %98 = vector.shape_cast %67 : vector<1x128xi1> to vector<1x128xi1>
    %99 = vector.broadcast %98 : vector<1x128xi1> to vector<24x128xi1>
    %100 = vector.broadcast %cst_27 : f32 to vector<24x128xf32>
    %101 = arith.select %99, %97, %100 : vector<24x128xi1>, vector<24x128xf32>
    %c3_28 = arith.constant 3 : index
    %c0_29 = arith.constant 0 : index
    %c0_30 = arith.constant 0 : index
    %102 = vector.load %arg5[%c3_28, %c0_29, %c0_30] : memref<9x24x1xf32, #tpu.memory_space<vmem>>, vector<1x24x1xf32>
    %103 = vector.shape_cast %102 : vector<1x24x1xf32> to vector<24x1xf32>
    %104 = vector.broadcast %103 : vector<24x1xf32> to vector<24x128xf32>
    %105 = arith.mulf %101, %104 : vector<24x128xf32>
    %106 = arith.addf %96, %105 : vector<24x128xf32>
    %107 = vector.extract_strided_slice %48 {offsets = [0, 17], sizes = [24, 128], strides = [1, 1]} : vector<24x162xf32> to vector<24x128xf32>
    %c4 = arith.constant 4 : index
    %c0_31 = arith.constant 0 : index
    %c0_32 = arith.constant 0 : index
    %108 = vector.load %arg5[%c4, %c0_31, %c0_32] : memref<9x24x1xf32, #tpu.memory_space<vmem>>, vector<1x24x1xf32>
    %109 = vector.shape_cast %108 : vector<1x24x1xf32> to vector<24x1xf32>
    %110 = vector.broadcast %109 : vector<24x1xf32> to vector<24x128xf32>
    %111 = arith.mulf %107, %110 : vector<24x128xf32>
    %112 = arith.addf %106, %111 : vector<24x128xf32>
    %113 = vector.extract_strided_slice %48 {offsets = [0, 18], sizes = [24, 128], strides = [1, 1]} : vector<24x162xf32> to vector<24x128xf32>
    %cst_33 = arith.constant 0.000000e+00 : f32
    %114 = vector.shape_cast %69 : vector<1x128xi1> to vector<1x128xi1>
    %115 = vector.broadcast %114 : vector<1x128xi1> to vector<24x128xi1>
    %116 = vector.broadcast %cst_33 : f32 to vector<24x128xf32>
    %117 = arith.select %115, %113, %116 : vector<24x128xi1>, vector<24x128xf32>
    %c5 = arith.constant 5 : index
    %c0_34 = arith.constant 0 : index
    %c0_35 = arith.constant 0 : index
    %118 = vector.load %arg5[%c5, %c0_34, %c0_35] : memref<9x24x1xf32, #tpu.memory_space<vmem>>, vector<1x24x1xf32>
    %119 = vector.shape_cast %118 : vector<1x24x1xf32> to vector<24x1xf32>
    %120 = vector.broadcast %119 : vector<24x1xf32> to vector<24x128xf32>
    %121 = arith.mulf %117, %120 : vector<24x128xf32>
    %122 = arith.addf %112, %121 : vector<24x128xf32>
    %123 = vector.extract_strided_slice %48 {offsets = [0, 32], sizes = [24, 128], strides = [1, 1]} : vector<24x162xf32> to vector<24x128xf32>
    %cst_36 = arith.constant 0.000000e+00 : f32
    %124 = vector.shape_cast %67 : vector<1x128xi1> to vector<1x128xi1>
    %125 = vector.broadcast %124 : vector<1x128xi1> to vector<24x128xi1>
    %126 = vector.broadcast %cst_36 : f32 to vector<24x128xf32>
    %127 = arith.select %125, %123, %126 : vector<24x128xi1>, vector<24x128xf32>
    %c6 = arith.constant 6 : index
    %c0_37 = arith.constant 0 : index
    %c0_38 = arith.constant 0 : index
    %128 = vector.load %arg5[%c6, %c0_37, %c0_38] : memref<9x24x1xf32, #tpu.memory_space<vmem>>, vector<1x24x1xf32>
    %129 = vector.shape_cast %128 : vector<1x24x1xf32> to vector<24x1xf32>
    %130 = vector.broadcast %129 : vector<24x1xf32> to vector<24x128xf32>
    %131 = arith.mulf %127, %130 : vector<24x128xf32>
    %132 = arith.addf %122, %131 : vector<24x128xf32>
    %133 = vector.extract_strided_slice %48 {offsets = [0, 33], sizes = [24, 128], strides = [1, 1]} : vector<24x162xf32> to vector<24x128xf32>
    %c7 = arith.constant 7 : index
    %c0_39 = arith.constant 0 : index
    %c0_40 = arith.constant 0 : index
    %134 = vector.load %arg5[%c7, %c0_39, %c0_40] : memref<9x24x1xf32, #tpu.memory_space<vmem>>, vector<1x24x1xf32>
    %135 = vector.shape_cast %134 : vector<1x24x1xf32> to vector<24x1xf32>
    %136 = vector.broadcast %135 : vector<24x1xf32> to vector<24x128xf32>
    %137 = arith.mulf %133, %136 : vector<24x128xf32>
    %138 = arith.addf %132, %137 : vector<24x128xf32>
    %139 = vector.extract_strided_slice %48 {offsets = [0, 34], sizes = [24, 128], strides = [1, 1]} : vector<24x162xf32> to vector<24x128xf32>
    %cst_41 = arith.constant 0.000000e+00 : f32
    %140 = vector.shape_cast %69 : vector<1x128xi1> to vector<1x128xi1>
    %141 = vector.broadcast %140 : vector<1x128xi1> to vector<24x128xi1>
    %142 = vector.broadcast %cst_41 : f32 to vector<24x128xf32>
    %143 = arith.select %141, %139, %142 : vector<24x128xi1>, vector<24x128xf32>
    %c8 = arith.constant 8 : index
    %c0_42 = arith.constant 0 : index
    %c0_43 = arith.constant 0 : index
    %144 = vector.load %arg5[%c8, %c0_42, %c0_43] : memref<9x24x1xf32, #tpu.memory_space<vmem>>, vector<1x24x1xf32>
    %145 = vector.shape_cast %144 : vector<1x24x1xf32> to vector<24x1xf32>
    %146 = vector.broadcast %145 : vector<24x1xf32> to vector<24x128xf32>
    %147 = arith.mulf %143, %146 : vector<24x128xf32>
    %148 = arith.addf %138, %147 : vector<24x128xf32>
    %c0_44 = arith.constant 0 : index
    %c0_45 = arith.constant 0 : index
    %149 = vector.load %arg6[%c0_44, %c0_45] : memref<24x1xf32, #tpu.memory_space<vmem>>, vector<24x1xf32>
    %150 = vector.broadcast %149 : vector<24x1xf32> to vector<24x128xf32>
    %151 = arith.addf %148, %150 : vector<24x128xf32>
    %cst_46 = arith.constant 0.000000e+00 : f32
    %cst_47 = arith.constant 6.000000e+00 : f32
    %152 = vector.broadcast %cst_46 : f32 to vector<24x128xf32>
    %153 = arith.maximumf %152, %151 : vector<24x128xf32>
    %154 = vector.broadcast %cst_47 : f32 to vector<24x128xf32>
    %155 = arith.minimumf %154, %153 : vector<24x128xf32>
    %c0_48 = arith.constant 0 : index
    %c0_49 = arith.constant 0 : index
    %156 = vector.load %arg7[%c0_48, %c0_49] : memref<4x24xf32, #tpu.memory_space<vmem>>, vector<4x24xf32>
    %cst_50 = arith.constant dense<0.000000e+00> : vector<4x128xf32>
    %157 = tpu.matmul %156, %155, %cst_50 {dimension_numbers = #tpu.dot_dimension_numbers<[1], [0], [0], [1], [0, 0, 1, 1], [], []>} : vector<4x24xf32>, vector<24x128xf32>, vector<4x128xf32> -> vector<4x128xf32>
    %c0_51 = arith.constant 0 : index
    %c0_52 = arith.constant 0 : index
    %158 = vector.load %arg8[%c0_51, %c0_52] : memref<4x1xf32, #tpu.memory_space<vmem>>, vector<4x1xf32>
    %159 = vector.broadcast %158 : vector<4x1xf32> to vector<4x128xf32>
    %160 = arith.addf %157, %159 : vector<4x128xf32>
    %161 = vector.extract_strided_slice %4 {offsets = [0, 17], sizes = [4, 128], strides = [1, 1]} : vector<4x162xf32> to vector<4x128xf32>
    %162 = arith.addf %160, %161 : vector<4x128xf32>
    %c0_53 = arith.constant 0 : index
    %c0_54 = arith.constant 0 : index
    %c0_55 = arith.constant 0 : index
    %163 = vector.load %arg9[%c0_53, %c0_54, %c0_55] : memref<1x4x128xf32, #tpu.memory_space<vmem>>, vector<1x4x128xf32>
    %164 = vector.shape_cast %163 : vector<1x4x128xf32> to vector<4x128xf32>
    %165 = vector.shape_cast %162 : vector<4x128xf32> to vector<1x4x128xf32>
    tpu.vector_store %arg9[%c0_53, %c0_54, %c0_55], %165 {strides = array<i32>} : memref<1x4x128xf32, #tpu.memory_space<vmem>>, vector<1x4x128xf32>,
    return
  }
  func.func @transform_0(%arg0: i32, %arg1: i32) -> (i32, i32, i32) {
    %c0_i32 = arith.constant 0 : i32
    %c0_i32_0 = arith.constant 0 : i32
    %c0_i32_1 = arith.constant 0 : i32
    return %arg0, %c0_i32, %c0_i32_0 : i32, i32, i32
  }
  func.func @transform_1(%arg0: i32, %arg1: i32) -> (i32, i32) {
    %c0_i32 = arith.constant 0 : i32
    %c0_i32_0 = arith.constant 0 : i32
    %c0_i32_1 = arith.constant 0 : i32
    return %c0_i32, %c0_i32_0 : i32, i32
  }
  func.func @transform_2(%arg0: i32, %arg1: i32) -> (i32, i32) {
    %c0_i32 = arith.constant 0 : i32
    %c0_i32_0 = arith.constant 0 : i32
    %c0_i32_1 = arith.constant 0 : i32
    return %c0_i32, %c0_i32_0 : i32, i32
  }
  func.func @transform_3(%arg0: i32, %arg1: i32) -> (i32, i32, i32) {
    %c0_i32 = arith.constant 0 : i32
    %c0_i32_0 = arith.constant 0 : i32
    %c0_i32_1 = arith.constant 0 : i32
    %c0_i32_2 = arith.constant 0 : i32
    return %c0_i32, %c0_i32_0, %c0_i32_1 : i32, i32, i32
  }
  func.func @transform_4(%arg0: i32, %arg1: i32) -> (i32, i32) {
    %c0_i32 = arith.constant 0 : i32
    %c0_i32_0 = arith.constant 0 : i32
    %c0_i32_1 = arith.constant 0 : i32
    return %c0_i32, %c0_i32_0 : i32, i32
  }
  func.func @transform_5(%arg0: i32, %arg1: i32) -> (i32, i32) {
    %c0_i32 = arith.constant 0 : i32
    %c0_i32_0 = arith.constant 0 : i32
    %c0_i32_1 = arith.constant 0 : i32
    return %c0_i32, %c0_i32_0 : i32, i32
  }
  func.func @transform_6(%arg0: i32, %arg1: i32) -> (i32, i32) {
    %c0_i32 = arith.constant 0 : i32
    %c0_i32_0 = arith.constant 0 : i32
    %c0_i32_1 = arith.constant 0 : i32
    return %c0_i32, %c0_i32_0 : i32, i32
  }
  func.func @transform_7(%arg0: i32, %arg1: i32) -> (i32, i32, i32) {
    %c0_i32 = arith.constant 0 : i32
    %c0_i32_0 = arith.constant 0 : i32
    return %arg0, %c0_i32, %arg1 : i32, i32, i32
  }
}

</mosaic_0001>

<bundles_post_ra>
// kernel: tpu_custom_call.1
= control target key start
LH: loop header
LB: loop body
LE: loop exit
PB: predicated region body
PF: predicated region fallthrough
CT: control target
= control target key end

     0   :  { %s1839_s0 = inlined_call_operand.vmem [shape: f32[2,4,290], index: 0, kind: input, shape index: {}]   ;;  %s1840_s1 = inlined_call_operand.vmem [shape: f32[24,4], index: 1, kind: input, shape index: {}]   ;;  %s1841_s2 = inlined_call_operand.vmem [shape: f32[24,1], index: 2, kind: input, shape index: {}]   ;;  %s1842_s3 = inlined_call_operand.vmem [shape: f32[9,24,1], index: 3, kind: input, shape index: {}]   ;;  %s1843_s4 = inlined_call_operand.vmem [shape: f32[24,1], index: 4, kind: input, shape index: {}]   ;;  %s1844_s5 = inlined_call_operand.vmem [shape: f32[4,24], index: 5, kind: input, shape index: {}]   ;;  %s1845_s6 = inlined_call_operand.vmem [shape: f32[4,1], index: 6, kind: input, shape index: {}]   ;;  %s1846_s7 = inlined_call_operand.hbm [shape: f32[2,4,256], index: 7, kind: output, shape index: {}]  }
   0x1   :  { %1850 = sst [smem:[#allocation8_spill]] %s1840_s1 }
   0x2   :  { %1851 = sst [smem:[#allocation9_spill]] %s1841_s2 }
   0x3   :  { %12 = vsyncpa [#allocation3], 0 }
   0x4   :  { %14 = vsyncpa [#allocation3 + $0x1], 0  ;;  %s1369_s24 = smov 0   ;;  %s1371_s25 = smov 0  }
   0x5   :  { %s1373_s26 = smov 0   ;;  %s1375_s27 = smov 0  }
   0x6   :  { %s1377_s28 = smov 0   ;;  %s1379_s29 = smov 0  }
   0x7   :  { %s1381_s30 = smov 0   ;;  %s1383_s8 = smov 0  }
   0x8 LB: > { %1852 = sst [smem:[#allocation5_spill]] %s1311_s30  ;;  %s1084_s9 = sadd.s32 4294967295, %s1315_s8   ;;  %s1315_s8 = sphi %s1383_s8, %s20_s8   ;;  %s1311_s30 = sphi %s1381_s30, %s1869_s30   ;;  %s1307_s29 = sphi %s1379_s29, %s1874_s29   ;;  %s1303_s28 = sphi %s1377_s28, %s1867_s28   ;;  %s1299_s27 = sphi %s1375_s27, %s1873_s27   ;;  %s1295_s26 = sphi %s1373_s26, %s1872_s26   ;;  %s1291_s25 = sphi %s1371_s25, %s1871_s25   ;;  %s1287_s24 = sphi %s1369_s24, %s1870_s24  }
   0x9   : > { %s1085_s10 = sadd.s32 4294967294, %s1315_s8   ;;  %s29_s11 = sadd.s32 1, %s1307_s29 }
   0xa   : > { %p30_p0 = scmp.ge.s32.totalorder %s29_s11, 2  ;;  %s32_s12 = sadd.s32 1, %s1311_s30 }
   0xb   : > { %p203_p1 = scmp.ne.s32.totalorder %s1295_s26, %s1291_s25  ;;  %p204_p2 = scmp.eq.s32.totalorder %s1084_s9, 3 }
   0xc   : > { %s1876_s11 = smov (%p30_p0, %s29_s11), 0  ;;  %s1878_s12 = smov (!%p30_p0, %s32_s12), %s1311_s30 }
   0xd   : > { %1853 = sst [smem:[#allocation6_spill]] %s1876_s11  ;;  %s189_s13 = ssub.s32 %s1307_s29, %s1876_s11 }
   0xe   : > { %p1420_p3 = por %p204_p2, %p203_p1  ;;  %p34_p4 = scmp.ge.s32.totalorder %s1878_s12, 2 }
   0xf   : > { %p209_p5 = scmp.ne.s32.totalorder %s1291_s25, %s1287_s24  ;;  %p210_p6 = scmp.eq.s32.totalorder %s1085_s10, 3 }
  0x10   : > { %p1088_p7 = scmp.ge.s32.totalorder %s1315_s8, 1  ;;  %s1880_s12 = smov (%p34_p4, %s1878_s12), 0 }
  0x11   : > { %1855 = sst [smem:[#allocation7_spill]] %s1880_s12  ;;  %p1429_p8 = por %p210_p6, %p209_p5 }
  0x12   : > { %p254_p9 = scmp.lt.s32.totalorder %s1315_s8, 5  ;;  %s188_s16 = ssub.s32 %s1311_s30, %s1880_s12 }
  0x13   : > { %s193_s17 = sadd.s32 1, %s1295_s26  ;;  %s190_s18 = sor.u32 %s189_s13, %s188_s16 }
  0x14   : > { %p255_p10 = pnand %p1088_p7, %p254_p9  ;;  %p191_p11 = scmp.eq.s32.totalorder %s190_s18, 0 }
  0x15   : > { %s1857_s1 = sld [smem:[#allocation8_spill]] (!%p255_p10)  ;;  %p286_p12 = scmp.lt.s32.totalorder (!%p255_p10), %s1303_s28, 1 }
  0x16   : > { %s1438_s19 = scalar_select %p191_p11, %s1295_s26, %s193_s17  }
  0x17   : > { %258 = sbr.rel (%p255_p10) target bundleno = 609 (0x261), region = 48  ;;  %s1858_s2 = sld [smem:[#allocation9_spill]] (!%p255_p10) }
  0x18   : > { %s1091_s18 = sshll.u32 (!%p255_p10), %s1299_s27, 7  ;;  %s1322_s23 = smov (!%p255_p10), 112  }
  0x19   : > { %s292_s10 = sshra.s32 (!%p255_p10), %s1091_s18, 7  ;;  %s1328_s13 = smov (!%p255_p10), 95  }
  0x1a   : > { %s1092_s11 = sshll.u32 (!%p255_p10), %s292_s10, 2  ;;  %s1325_s10 = smov (!%p255_p10), 111  }
  0x1b   : > { %s283_s22 = sand.u32 (!%p255_p10), 1, %s1291_s25   ;;  %s1241_s21 = scalar_lea.hbm (!%p255_p10), %s1846_s7, 16 }
  0x1c   : > { %v299_v0 = vld [vmem:[%s1857_s1 + $0x10] sm:$0xff]  ;;  %v298_v1 = vld [vmem:[%s1857_s1 + $0x8] sm:$0xff]  ;;  %v297_v2 = vld [vmem:[%s1857_s1] sm:$0xff]  ;;  %v1317_v3 = vmov 2   ;;  %v1318_v4 = vmov 1   ;;  %v1319_v5 = vmov 0   ;;  %v454_v35 = vlaneseq }
  0x1d   : > { %1212 = vset.pattern.permute.xlu0 %v1317_v3  ;;  %1211 = vset.pattern.permute.xlu2 %v1318_v4  ;;  %v1320_v6 = vmov 3   ;;  %v498_v7 = vld [vmem:[%s1842_s3 + $0x8] sm:$0xff]  ;;  %v418_v9 = vld [vmem:[%s1858_s2] sm:$0xff]  ;;  %v1098_v10 = vld [vmem:[%s1842_s3 + $0x30] sm:$0xff]  ;;  %s287_s17 = scalar_select %p286_p12, %s1303_s28, 1  ;;  %v457_v46 = vstv %s1091_s18  ;;  %vm594_vm7 = vcmask 1031168  }
  0x1e   : > { %1209 = vset.pattern.permute.xlu1 %v1319_v5  ;;  %333 = vperm.xlu2 %1211, %v298_v1   ;;  %v419_v8 = vld [vmem:[%s1858_s2 + $0x8] sm:$0xff]  ;;  %v497_v11 = vld [vmem:[%s1842_s3] sm:$0xff]  ;;  %v420_v12 = vld [vmem:[%s1858_s2 + $0x10] sm:$0xff]  ;;  %v1515_v43 = vand.u32 127, %v454_v35  ;;  %s1321_s18 = smov 126   ;;  %s1323_s1 = smov 127  }
  0x1f   : > { %312 = vperm.xlu1 %1209, %v299_v0   ;;  %359 = vperm.xlu0 %1212, %v297_v2   ;;  %v1105_v13 = vld [vmem:[%s1842_s3 + $0x68] sm:$0xff]  ;;  %v1095_v14 = vld [vmem:[%s1842_s3 + $0x18] sm:$0xff]  ;;  %s1125_s9 = smul.u32 12, %s287_s17  ;;  %v499_v15 = vld [vmem:[%s1842_s3 + $0x10] sm:$0xff]  ;;  %s1326_s17 = smov 96   ;;  %vm641_vm9 = vcmask 916480  }
  0x20   : > { %v1114_v16 = vld [vmem:[%s1842_s3 + $0xb0] sm:$0xff]  ;;  %v1097_v17 = vld [vmem:[%s1842_s3 + $0x28] sm:$0xff]  ;;  %v1096_v18 = vld [vmem:[%s1842_s3 + $0x20] sm:$0xff]  ;;  %v458_v59 = vadd.s32 %v457_v46, %v1515_v43  ;;  %v456_v60 = vadd.s32 128, %v1515_v43  ;;  %vm564_vm10 = vcmask 1039360   ;;  %vm719_vm11 = vcmask 908288  }
  0x21   : > { %s290_s2 = scalar_lea.vmem %s1839_s0, %s1125_s9  ;;  %v1100_v20 = vld [vmem:[%s1842_s3 + $0x40] sm:$0xff]  ;;  %v1099_v21 = vld [vmem:[%s1842_s3 + $0x38] sm:$0xff]  ;;  %v1106_v22 = vld [vmem:[%s1842_s3 + $0x70] sm:$0xff]  ;;  %vm741_vm12 = vcmask 900096   ;;  %vm788_vm13 = vcmask 785408   ;;  %vm888_vm14 = vcmask 769024  }
  0x22   : > { %s295_s20 = scalar_lea.vmem %s290_s2, %s1092_s11  ;;  %v1104_v23 = vld [vmem:[%s1842_s3 + $0x60] sm:$0xff]  ;;  %v1115_v24 = vld [vmem:[%s1842_s3 + $0xb8] sm:$0xff]  ;;  %v1113_v25 = vld [vmem:[%s1842_s3 + $0xa8] sm:$0xff]  ;;  %s1324_s11 = smov 110   ;;  %vm866_vm15 = vcmask 777216  }
  0x23   : > { %v296_v19 = vld [vmem:[%s295_s20] sm:$0xff] }
  0x24   : > { %981 = vst [vmem:[#allocation1] ss:$2 sm:$0xff] %v296_v19  ;;  %v316_v36 = vperm.slane %v296_v19, 0  ;;  %v317_v37 = vperm.slane %v296_v19, 4  ;;  %v340_v38 = vperm.slane %v296_v19, 1  ;;  %v341_v39 = vperm.slane %v296_v19, 5 }
  0x25   : > { %v370_v40 = vperm.slane %v296_v19, 2  ;;  %v371_v41 = vperm.slane %v296_v19, 6  ;;  %v400_v42 = vperm.slane %v296_v19, 3  ;;  %v401_v51 = vperm.slane %v296_v19, 7 }
  0x26   : > { %337 = vperm.xlu2 %1211, %v299_v0   ;;  %v320_v44 = vperm.slane %v316_v36, 0  ;;  %v321_v45 = vperm.slane %v317_v37, 0  ;;  %v344_v47 = vperm.slane %v340_v38, 1  ;;  %v345_v48 = vperm.slane %v341_v39, 1 }
  0x27   : > { %1210 = vset.pattern.permute.xlu1 %v1318_v4  ;;  %1217 = vset.pattern.permute.xlu0 %v1320_v6  ;;  %v374_v49 = vperm.slane %v370_v40, 2  ;;  %v375_v52 = vperm.slane %v371_v41, 2  ;;  %v404_v53 = vperm.slane %v400_v42, 3 }
  0x28   : > { %397 = vperm.xlu0 %1217, %v299_v0   ;;  %329 = vperm.xlu1 %1210, %v297_v2  }
  0x2e   : > { %1214 = vset.pattern.permute.xlu2 %v1317_v3 }
  0x2f   : > { %367 = vperm.xlu2 %1214, %v299_v0  }
  0x30   : > { %1218 = vset.pattern.permute.xlu0 %v1319_v5  ;;  %1213 = vset.pattern.permute.xlu1 %v1317_v3  ;;  %v405_v3 = vperm.slane %v401_v51, 3 }
  0x31   : > { %302 = vperm.xlu0 %1218, %v297_v2   ;;  %363 = vperm.xlu1 %1213, %v298_v1  }
  0x37   : > { %1216 = vset.pattern.permute.xlu2 %v1320_v6 }
  0x38   : > { %393 = vperm.xlu2 %1216, %v298_v1  }
  0x39   : > { %307 = vperm.xlu0 %1218, %v298_v1   ;;  %1215 = vset.pattern.permute.xlu1 %v1320_v6 }
  0x3a   : > { %389 = vperm.xlu1 %1215, %v297_v2  }
  0x40   : > { %1220 = vset.pattern.permute.xlu2 %v1319_v5 }
  0x41   : > { %507 = vperm.xlu0 %1218, %v498_v7   ;;  %428 = vperm.xlu2 %1220, %v419_v8  }
  0x42   : > { %1219 = vset.pattern.permute.xlu1 %v1319_v5 }
  0x43   : > { %423 = vperm.xlu1 %1219, %v418_v9  }
  0x49   : > { %610 = vperm.xlu0 %1218, %v1098_v10   ;;  %502 = vperm.xlu2 %1220, %v497_v11  }
  0x4b   : > { %433 = vperm.xlu1 %1219, %v420_v12   ;;  %v1093_v12 = vadd.s32 4294967279, %v458_v59 }
  0x4d   : > { %vm462_vm0 = vcmp.ge.s32.totalorder %v1093_v12, 0  ;;  %vm464_vm1 = vcmp.lt.s32.totalorder %v1093_v12, 256 }
  0x4e   : > { %vm1526_vm2 = vmand %vm462_vm0, %vm464_vm1  ;;  %vm957_vm0 = vcmask 195584  }
  0x51   : > { %687 = vperm.xlu0 %1218, %v1105_v13   ;;  %527 = vperm.xlu2 %1220, %v1095_v14   ;;  %v459_v13 = vadd.s32 %v457_v46, %v456_v60 }
  0x53   : > { %512 = vperm.xlu1 %1219, %v499_v15  }
  0x59   : > { %834 = vperm.xlu0 %1218, %v1114_v16   ;;  %537 = vperm.xlu2 %1220, %v1097_v17  }
  0x5b   : > { %532 = vperm.xlu1 %1219, %v1096_v18  }
  0x61   : > { %620 = vperm.xlu2 %1220, %v1100_v20  }
  0x63   : > { %615 = vperm.xlu1 %1219, %v1099_v21  }
  0x69   : > { %692 = vperm.xlu2 %1220, %v1106_v22  }
  0x6b   : > { %682 = vperm.xlu1 %1219, %v1104_v23  }
  0x71   : > { %839 = vperm.xlu2 %1220, %v1115_v24  }
  0x73   : > { %829 = vperm.xlu1 %1219, %v1113_v25  }
  0x78   : > { %v334_v26 = vpop.permute.xlu2 %333 }
  0x79   : > { %v348_v56 = vmul.f32 %v344_v47, %v334_v26  ;;  %v349_v57 = vmul.f32 %v345_v48, %v334_v26 }
  0x80   : > { %v338_v29 = vpop.permute.xlu2 %337 }
  0x81   : > { %v350_v2 = vmul.f32 %v344_v47, %v338_v29  ;;  %v351_v18 = vmul.f32 %v345_v48, %v338_v29 }
  0x89   : > { %v1513_v32 = vpop.permute.xlu2 %367 }
  0x8a   : > { %v380_v36 = vmul.f32 %v374_v49, %v1513_v32  ;;  %v381_v29 = vmul.f32 %v375_v52, %v1513_v32 }
  0x91   : > { %v313_v27 = vpop.permute.xlu1 %312  ;;  %v360_v28 = vpop.permute.xlu0 %359 }
  0x92   : > { %v394_v50 = vpop.permute.xlu2 %393  ;;  %v376_v10 = vmul.f32 %v374_v49, %v360_v28  ;;  %v377_v14 = vmul.f32 %v375_v52, %v360_v28  ;;  %v326_v19 = vmul.f32 %v320_v44, %v313_v27  ;;  %v327_v22 = vmul.f32 %v321_v45, %v313_v27 }
  0x93   : > { %v408_v4 = vmul.f32 %v404_v53, %v394_v50  ;;  %v409_v20 = vmul.f32 %v405_v3, %v394_v50 }
  0x94   : > { %v356_v37 = vadd.f32 %v350_v2, %v326_v19  ;;  %v357_v27 = vadd.f32 %v351_v18, %v327_v22 }
  0x96   : > { %v386_v51 = vadd.f32 %v380_v36, %v356_v37 }
  0x9a   : > { %v1511_v30 = vpop.permute.xlu0 %397  ;;  %v330_v31 = vpop.permute.xlu1 %329 }
  0x9b   : > { %v346_v61 = vmul.f32 %v344_v47, %v330_v31  ;;  %v347_v62 = vmul.f32 %v345_v48, %v330_v31  ;;  %v429_v26 = vpop.permute.xlu2 %428  ;;  %v482_v31 = vand.u32 15, %v1515_v43  ;;  %v411_v32 = vmul.f32 %v405_v3, %v1511_v30 }
  0x9d   : > { %vm1532_vm3 = vcmp.gt.s32.totalorder %v482_v31, 0  ;;  %vm1670_vm8 = vcmp.lt.s32.totalorder %v482_v31, 15 }
  0xa3   : > { %v303_v33 = vpop.permute.xlu0 %302  ;;  %v364_v34 = vpop.permute.xlu1 %363 }
  0xa4   : > { %v322_v54 = vmul.f32 %v320_v44, %v303_v33  ;;  %v323_v55 = vmul.f32 %v321_v45, %v303_v33  ;;  %v378_v5 = vmul.f32 %v374_v49, %v364_v34  ;;  %v379_v11 = vmul.f32 %v375_v52, %v364_v34 }
  0xa5   : > { %v1094_v33 = vadd.s32 4294967279, %v459_v13 }
  0xa6   : > { %v352_v6 = vadd.f32 %v346_v61, %v322_v54  ;;  %v353_v7 = vadd.f32 %v347_v62, %v323_v55  ;;  %v387_v55 = vadd.f32 %v381_v29, %v357_v27  ;;  %v1101_v29 = vld [vmem:[%s1842_s3 + $0x48] sm:$0xff] }
  0xa7   : > { %vm463_vm4 = vcmp.ge.s32.totalorder %v1094_v33, 0  ;;  %vm465_vm5 = vcmp.lt.s32.totalorder %v1094_v33, 256  ;;  %v1102_v33 = vld [vmem:[%s1842_s3 + $0x50] sm:$0xff] }
  0xa8   : > { %v382_v24 = vadd.f32 %v376_v10, %v352_v6  ;;  %v383_v25 = vadd.f32 %v377_v14, %v353_v7  ;;  %vm1544_vm6 = vmand %vm463_vm4, %vm465_vm5  ;;  %v417_v62 = vadd.f32 %v411_v32, %v387_v55 }
  0xab   : > { %v308_v58 = vpop.permute.xlu0 %307 }
  0xac   : > { %v324_v63 = vmul.f32 %v320_v44, %v308_v58  ;;  %v325_v0 = vmul.f32 %v321_v45, %v308_v58  ;;  %v390_v1 = vpop.permute.xlu1 %389  ;;  %v410_v44 = vmul.f32 %v404_v53, %v1511_v30 }
  0xad   : > { %v406_v16 = vmul.f32 %v404_v53, %v390_v1  ;;  %v407_v17 = vmul.f32 %v405_v3, %v390_v1 }
  0xae   : > { %v354_v8 = vadd.f32 %v348_v56, %v324_v63  ;;  %v355_v9 = vadd.f32 %v349_v57, %v325_v0  ;;  %v416_v30 = vadd.f32 %v410_v44, %v386_v51  ;;  %v503_v63 = vpop.permute.xlu2 %502  ;;  %v1108_v44 = vld [vmem:[%s1842_s3 + $0x80] sm:$0xff] }
  0xaf   : > { %v412_v35 = vadd.f32 %v406_v16, %v382_v24  ;;  %v413_v28 = vadd.f32 %v407_v17, %v383_v25 }
  0xb0   : > { %v384_v15 = vadd.f32 %v378_v5, %v354_v8  ;;  %v385_v21 = vadd.f32 %v379_v11, %v355_v9 }
  0xb2   : > { %v414_v23 = vadd.f32 %v408_v4, %v384_v15  ;;  %v415_v38 = vadd.f32 %v409_v20, %v385_v21 }
  0xb3   : > { %v508_v56 = vpop.permute.xlu0 %507 }
  0xb4   : > { %v438_v34 = vadd.f32 %v429_v26, %v414_v23  ;;  %v439_v50 = vadd.f32 %v429_v26, %v415_v38  ;;  %v1109_v38 = vld [vmem:[%s1842_s3 + $0x88] sm:$0xff] }
  0xb5   : > { %v424_v39 = vpop.permute.xlu1 %423 }
  0xb6   : > { %v444_v40 = vmax.f32 %v438_v34, 0.0  ;;  %v436_v41 = vadd.f32 %v424_v39, %v412_v35  ;;  %v437_v42 = vadd.f32 %v424_v39, %v413_v28  ;;  %v445_v0 = vmax.f32 %v439_v50, 0.0  ;;  %v528_v17 = vpop.permute.xlu2 %527  ;;  %v1103_v34 = vld [vmem:[%s1842_s3 + $0x58] sm:$0xff] }
  0xb7   : > { %v1107_v50 = vld [vmem:[%s1842_s3 + $0x78] sm:$0xff] }
  0xb8   : > { %v450_v47 = vmin.f32 %v444_v40, 6.0  ;;  %v442_v48 = vmax.f32 %v436_v41, 0.0  ;;  %v443_v49 = vmax.f32 %v437_v42, 0.0  ;;  %v451_v8 = vmin.f32 %v445_v0, 6.0 }
  0xba   : > { %v1539_v52 = vsel %vm1526_vm2, %v450_v47, 0.0  ;;  %v448_v53 = vmin.f32 %v442_v48, 6.0  ;;  %v449_v54 = vmin.f32 %v443_v49, 6.0  ;;  %v1576_v13 = vsel %vm1544_vm6, %v451_v8, 0.0  ;;  %v1112_v47 = vld [vmem:[%s1842_s3 + $0xa0] sm:$0xff] }
  0xbb   : > { %v495_v57 = vsel %vm1532_vm3, %v1539_v52, 0.0  ;;  %586 = vrot.lane.b32.xlu2 %v1539_v52, %s1321_s18  ;;  %v1621_v37 = vpop.permute.xlu0 %610 }
  0xbc   : > { %v1549_v59 = vmul.f32 %v508_v56, %v495_v57  ;;  %v1553_v60 = vsel %vm1526_vm2, %v448_v53, 0.0  ;;  %v1557_v61 = vsel %vm1544_vm6, %v449_v54, 0.0  ;;  %v1111_v56 = vld [vmem:[%s1842_s3 + $0x98] sm:$0xff] }
  0xbd   : > { %v434_v1 = vpop.permute.xlu1 %433  ;;  %584 = vrot.lane.b32.xlu1 %v1557_v61, %s1321_s18  ;;  %582 = vrot.lane.b32.xlu0 %v1553_v60, %s1321_s18  ;;  %v494_v2 = vsel %vm1532_vm3, %v1553_v60, 0.0  ;;  %v541_v20 = vmul.f32 %v528_v17, %v1557_v61  ;;  %v540_v22 = vmul.f32 %v528_v17, %v1553_v60 }
  0xbe   : > { %v440_v3 = vadd.f32 %v434_v1, %v416_v30  ;;  %v441_v4 = vadd.f32 %v434_v1, %v417_v62  ;;  %v1564_v5 = vmul.f32 %v503_v63, %v494_v2  ;;  %v538_v21 = vpop.permute.xlu2 %537 }
  0xc0   : > { %v446_v6 = vmax.f32 %v440_v3, 0.0  ;;  %v447_v7 = vmax.f32 %v441_v4, 0.0 }
  0xc2   : > { %v452_v9 = vmin.f32 %v446_v6, 6.0  ;;  %v453_v10 = vmin.f32 %v447_v7, 6.0 }
  0xc3   : > { %v688_v39 = vpop.permute.xlu0 %687 }
  0xc4   : > { %v1568_v11 = vsel %vm1526_vm2, %v452_v9, 0.0  ;;  %v1572_v12 = vsel %vm1544_vm6, %v453_v10, 0.0  ;;  %v698_v27 = vmul.f32 %v688_v39, %v1576_v13  ;;  %v697_v40 = vmul.f32 %v688_v39, %v1539_v52  ;;  %v1110_v9 = vld [vmem:[%s1842_s3 + $0x90] sm:$0xff] }
  0xc5   : > { %v513_v14 = vpop.permute.xlu1 %512  ;;  %v496_v15 = vsel %vm1532_vm3, %v1568_v11, 0.0  ;;  %590 = vrot.lane.b32.xlu1 %v1568_v11, %s1321_s18  ;;  %592 = vrot.lane.b32.xlu2 %v1572_v12, %s1321_s18  ;;  %v544_v23 = vmul.f32 %v538_v21, %v1568_v11  ;;  %v545_v24 = vmul.f32 %v538_v21, %v1572_v12 }
  0xc6   : > { %v1583_v16 = vmul.f32 %v513_v14, %v496_v15  ;;  %588 = vrot.lane.b32.xlu0 %v1576_v13, %s1321_s18  ;;  %v1598_v26 = vpop.permute.xlu2 %620 }
  0xcb   : > { %v835_v55 = vpop.permute.xlu0 %834 }
  0xcc   : > { %v844_v17 = vmul.f32 %v835_v55, %v1539_v52 }
  0xcd   : > { %631 = vrot.lane.b32.xlu1 %v1557_v61, %s1322_s23  ;;  %633 = vrot.lane.b32.xlu2 %v1539_v52, %s1322_s23  ;;  %v533_v18 = vpop.permute.xlu1 %532 }
  0xce   : > { %629 = vrot.lane.b32.xlu0 %v1553_v60, %s1322_s23  ;;  %v542_v19 = vmul.f32 %v533_v18, %v1539_v52  ;;  %v543_v25 = vmul.f32 %v533_v18, %v1576_v13  ;;  %v693_v35 = vpop.permute.xlu2 %692  ;;  %v845_v18 = vmul.f32 %v835_v55, %v1576_v13 }
  0xcf   : > { %v699_v28 = vmul.f32 %v693_v35, %v1568_v11  ;;  %v700_v36 = vmul.f32 %v693_v35, %v1572_v12 }
  0xd5   : > { %637 = vrot.lane.b32.xlu1 %v1568_v11, %s1322_s23  ;;  %639 = vrot.lane.b32.xlu2 %v1572_v12, %s1322_s23  ;;  %v1635_v41 = vpop.permute.xlu1 %615 }
  0xd6   : > { %635 = vrot.lane.b32.xlu0 %v1576_v13, %s1322_s23  ;;  %v840_v42 = vpop.permute.xlu2 %839  ;;  %s1089_s23 = sshll.u32 %s283_s22, 2 }
  0xd7   : > { %v846_v1 = vmul.f32 %v840_v42, %v1568_v11  ;;  %v847_v2 = vmul.f32 %v840_v42, %v1572_v12  ;;  %s285_s30 = scalar_lea.vmem [#allocation2], %s1089_s23 }
  0xdd   : > { %554 = vrot.lane.b32.xlu1 %v541_v20, %s1323_s1  ;;  %556 = vrot.lane.b32.xlu2 %v542_v19, %s1323_s1  ;;  %v683_v32 = vpop.permute.xlu1 %682  ;;  %v1118_v19 = vld [vmem:[%s1842_s3 + $0xd0] sm:$0xff] }
  0xde   : > { %552 = vrot.lane.b32.xlu0 %v540_v22, %s1323_s1  ;;  %v695_v48 = vmul.f32 %v683_v32, %v1553_v60  ;;  %v696_v51 = vmul.f32 %v683_v32, %v1557_v61 }
  0xe5   : > { %560 = vrot.lane.b32.xlu1 %v544_v23, %s1323_s1  ;;  %562 = vrot.lane.b32.xlu2 %v545_v24, %s1323_s1  ;;  %v1659_v53 = vpop.permute.xlu1 %829 }
  0xe6   : > { %558 = vrot.lane.b32.xlu0 %v543_v25, %s1323_s1  ;;  %v843_v39 = vmul.f32 %v1659_v53, %v1557_v61 }
  0xed   : > { %662 = vperm.xlu1 %1219, %v1102_v33   ;;  %737 = vrot.lane.b32.xlu2 %v1568_v11, %s1324_s11 }
  0xee   : > { %667 = vperm.xlu0 %1218, %v1103_v34  }
  0xf5   : > { %715 = vrot.lane.b32.xlu1 %v699_v28, %s1325_s10  ;;  %717 = vrot.lane.b32.xlu2 %v700_v36, %s1325_s10 }
  0xf6   : > { %739 = vrot.lane.b32.xlu0 %v1572_v12, %s1324_s11 }
  0xfd   : > { %733 = vrot.lane.b32.xlu1 %v1539_v52, %s1324_s11  ;;  %735 = vrot.lane.b32.xlu2 %v1576_v13, %s1324_s11 }
  0xfe   : > { %657 = vperm.xlu0 %1218, %v1101_v29  }
 0x105   : > { %784 = vrot.lane.b32.xlu1 %v1568_v11, %s1326_s17  ;;  %786 = vrot.lane.b32.xlu2 %v1572_v12, %s1326_s17 }
 0x106   : > { %767 = vperm.xlu0 %1218, %v1109_v38   ;;  %v1116_v38 = vld [vmem:[%s1842_s3 + $0xc0] sm:$0xff] }
 0x10d   : > { %713 = vrot.lane.b32.xlu1 %v698_v27, %s1325_s10  ;;  %729 = vrot.lane.b32.xlu2 %v1553_v60, %s1324_s11  ;;  %v842_v27 = vmul.f32 %v1659_v53, %v1553_v60 }
 0x10e   : > { %711 = vrot.lane.b32.xlu0 %v697_v40, %s1325_s10 }
 0x115   : > { %762 = vperm.xlu1 %1219, %v1108_v44   ;;  %780 = vrot.lane.b32.xlu2 %v1539_v52, %s1326_s17  ;;  %v587_v45 = vpop.permute.xlu2 %586 }
 0x116   : > { %731 = vrot.lane.b32.xlu0 %v1557_v61, %s1324_s11  ;;  %s1327_s11 = smov 94  }
 0x11d   : > { %814 = vperm.xlu1 %1219, %v1112_v47   ;;  %707 = vrot.lane.b32.xlu2 %v695_v48, %s1325_s10  ;;  %v924_v48 = vld [vmem:[%s1843_s4 + $0x8] sm:$0xff] }
 0x11e   : > { %782 = vrot.lane.b32.xlu0 %v1576_v13, %s1326_s17 }
 0x11f   : > { %v593_v49 = vpop.permute.xlu2 %592 }
 0x125   : > { %757 = vperm.xlu1 %1219, %v1107_v50   ;;  %776 = vrot.lane.b32.xlu2 %v1553_v60, %s1326_s17 }
 0x126   : > { %709 = vrot.lane.b32.xlu0 %v696_v51, %s1325_s10 }
 0x127   : > { %v634_v54 = vpop.permute.xlu2 %633 }
 0x12d   : > { %809 = vperm.xlu1 %1219, %v1111_v56   ;;  %884 = vrot.lane.b32.xlu2 %v1568_v11, %s1327_s11 }
 0x12e   : > { %778 = vrot.lane.b32.xlu0 %v1557_v61, %s1326_s17  ;;  %s1121_s17 = sshll.u32 %s1303_s28, 1 }
 0x12f   : > { %v585_v57 = vpop.permute.xlu1 %584  ;;  %v640_v58 = vpop.permute.xlu2 %639  ;;  %s1003_s18 = sadd.s32 %s1299_s27, %s1121_s17  ;;  %s993_s27 = scalar_lea.sflag [#allocation3], %s283_s22 }
 0x130   : > { %v583_v62 = vpop.permute.xlu0 %582  ;;  %s1122_s1 = sshll.u32 %s1003_s18, 2 }
 0x131   : > { %v595_v63 = vsel %vm594_vm7, %v583_v62, %v585_v57  ;;  %v951_v57 = vld [vmem:[%s1845_s6] sm:$0xf]  ;;  %s1005_s2 = scalar_lea.hbm %s1846_s7, %s1122_s1 }
 0x132   : > { %v601_v0 = vsel %vm1670_vm8, %v595_v63, 0.0 }
 0x133   : > { %v623_v36 = vmul.f32 %v1621_v37, %v601_v0 }
 0x135   : > { %862 = vrot.lane.b32.xlu1 %v846_v1, %s1328_s13  ;;  %864 = vrot.lane.b32.xlu2 %v847_v2, %s1328_s13 }
 0x136   : > { %886 = vrot.lane.b32.xlu0 %v1572_v12, %s1327_s11 }
 0x137   : > { %v591_v43 = vpop.permute.xlu1 %590  ;;  %v557_v31 = vpop.permute.xlu2 %556 }
 0x138   : > { %v597_v3 = vsel %vm594_vm7, %v591_v43, %v593_v49  ;;  %v589_v4 = vpop.permute.xlu0 %588  ;;  %v923_v49 = vld [vmem:[%s1843_s4] sm:$0xff] }
 0x139   : > { %v603_v6 = vsel %vm1670_vm8, %v597_v3, 0.0  ;;  %v596_v7 = vsel %vm594_vm7, %v587_v45, %v589_v4 }
 0x13a   : > { %v602_v8 = vsel %vm1670_vm8, %v596_v7, 0.0  ;;  %v625_v45 = vmul.f32 %v1598_v26, %v603_v6  ;;  %v925_v26 = vld [vmem:[%s1843_s4 + $0x10] sm:$0xff] }
 0x13b   : > { %v624_v47 = vmul.f32 %v1635_v41, %v602_v8 }
 0x13d   : > { %880 = vrot.lane.b32.xlu1 %v1539_v52, %s1327_s11  ;;  %882 = vrot.lane.b32.xlu2 %v1576_v13, %s1327_s11  ;;  %v1117_v13 = vld [vmem:[%s1842_s3 + $0xc8] sm:$0xff] }
 0x13e   : > { %804 = vperm.xlu0 %1218, %v1110_v9  }
 0x13f   : > { %v632_v10 = vpop.permute.xlu1 %631  ;;  %v563_v11 = vpop.permute.xlu2 %562 }
 0x140   : > { %v630_v12 = vpop.permute.xlu0 %629 }
 0x141   : > { %v1697_v14 = vsel %vm641_vm9, %v630_v12, %v632_v10 }
 0x142   : > { %v648_v15 = vsel %vm1532_vm3, %v1697_v14, 0.0 }
 0x145   : > { %858 = vrot.lane.b32.xlu1 %v844_v17, %s1328_s13  ;;  %860 = vrot.lane.b32.xlu2 %v845_v18, %s1328_s13 }
 0x146   : > { %914 = vperm.xlu0 %1218, %v1118_v19  }
 0x147   : > { %v638_v20 = vpop.permute.xlu1 %637  ;;  %v738_v21 = vpop.permute.xlu2 %737 }
 0x148   : > { %v644_v22 = vsel %vm641_vm9, %v638_v20, %v640_v58  ;;  %v636_v23 = vpop.permute.xlu0 %635 }
 0x149   : > { %v643_v24 = vsel %vm641_vm9, %v634_v54, %v636_v23  ;;  %v650_v52 = vsel %vm1532_vm3, %v644_v22, 0.0 }
 0x14a   : > { %v649_v25 = vsel %vm1532_vm3, %v643_v24, 0.0 }
 0x14d   : > { %878 = vrot.lane.b32.xlu1 %v1557_v61, %s1327_s11  ;;  %909 = vperm.xlu2 %1220, %v1117_v13  }
 0x14e   : > { %876 = vrot.lane.b32.xlu0 %v1553_v60, %s1327_s11  ;;  %s1007_s11 = sshll.u32 %s285_s30, 4  ;;  %s1008_s11 = int_to_ptr.vmem [resolvable:$true] %s1007_s11 }
 0x14f   : > { %v555_v33 = vpop.permute.xlu1 %554  ;;  %v718_v34 = vpop.permute.xlu2 %717 }
 0x150   : > { %v553_v35 = vpop.permute.xlu0 %552 }
 0x151   : > { %v565_v28 = vsel %vm564_vm10, %v553_v35, %v555_v33 }
 0x152   : > { %v571_v29 = vadd.f32 %v565_v28, %v1564_v5 }
 0x154   : > { %v626_v40 = vadd.f32 %v623_v36, %v571_v29 }
 0x155   : > { %856 = vrot.lane.b32.xlu1 %v843_v39, %s1328_s13  ;;  %904 = vperm.xlu2 %1220, %v1116_v38  }
 0x156   : > { %854 = vrot.lane.b32.xlu0 %v842_v27, %s1328_s13  ;;  %s1009_s13 = sshll.u32 %s1005_s2, 4  ;;  %s1010_s13 = int_to_ptr.hbm [resolvable:$true] %s1009_s13 }
 0x157   : > { %v561_v42 = vpop.permute.xlu1 %560  ;;  %v736_v37 = vpop.permute.xlu2 %735  ;;  %s1235_s28 = sshra.s32 %s1010_s13, 4  ;;  %s1236_s28 = int_to_ptr.hbm [resolvable:$true] %s1235_s28 }
 0x158   : > { %v567_v5 = vsel %vm564_vm10, %v561_v42, %v563_v11  ;;  %v559_v44 = vpop.permute.xlu0 %558  ;;  %s1237_s16 = scalar_lea.hbm %s1236_s28, 4  ;;  %p1242_p2 = scmp.lt.s32.totalorder %s1236_s28, %s1846_s7 }
 0x159   : > { %v573_v32 = vadd.f32 %v567_v5, %v1583_v16  ;;  %v566_v61 = vsel %vm564_vm10, %v557_v31, %v559_v44  ;;  %p1238_p13 = scmp.ne.s32.totalorder %s1236_s28, %s1237_s16  ;;  %p1243_p4 = scmp.lt.s32.totalorder %s1241_s21, %s1237_s16 }
 0x15a   : > { %v572_v60 = vadd.f32 %v566_v61, %v1549_v59 }
 0x15b   : > { %v628_v50 = vadd.f32 %v625_v45, %v573_v32  ;;  %p1239_p0 = pnand %p1238_p13, %p1420_p3  ;;  %p1244_p5 = por %p1243_p4, %p1242_p2 }
 0x15c   : > { %v627_v16 = vadd.f32 %v624_v47, %v572_v60 }
 0x15d   : > { %933 = vperm.xlu1 %1219, %v924_v48   ;;  %928 = vperm.xlu2 %1220, %v923_v49   ;;  %p1240_p1 = pneg %p1239_p0 }
 0x15e   : > { %938 = vperm.xlu0 %1218, %v925_v26  }
 0x15f   : > { %v663_v41 = vpop.permute.xlu1 %662  ;;  %v787_v51 = vpop.permute.xlu2 %786  ;;  %p1245_p6 = pnand %p1244_p5, %p1240_p1 }
 0x160   : > { %v671_v59 = vmul.f32 %v663_v41, %v649_v25  ;;  %v668_v53 = vpop.permute.xlu0 %667 }
 0x161   : > { %v672_v54 = vmul.f32 %v668_v53, %v650_v52 }
 0x162   : > { %v674_v55 = vadd.f32 %v671_v59, %v627_v16 }
 0x163   : > { %v675_v56 = vadd.f32 %v672_v54, %v628_v50 }
 0x166   : > { %954 = vperm.xlu0 %1218, %v951_v57  }
 0x167   : > { %v716_v58 = vpop.permute.xlu1 %715  ;;  %v730_v63 = vpop.permute.xlu2 %729 }
 0x168   : > { %v722_v62 = vsel %vm719_vm11, %v716_v58, %v718_v34  ;;  %v740_v0 = vpop.permute.xlu0 %739 }
 0x169   : > { %v728_v1 = vadd.f32 %v722_v62, %v675_v56  ;;  %v744_v2 = vsel %vm741_vm12, %v738_v21, %v740_v0 }
 0x16a   : > { %v750_v43 = vsel %vm1670_vm8, %v744_v2, 0.0 }
 0x16f   : > { %v734_v31 = vpop.permute.xlu1 %733  ;;  %v781_v8 = vpop.permute.xlu2 %780 }
 0x170   : > { %v743_v3 = vsel %vm741_vm12, %v734_v31, %v736_v37  ;;  %v658_v4 = vpop.permute.xlu0 %657 }
 0x171   : > { %v670_v6 = vmul.f32 %v658_v4, %v648_v15  ;;  %v749_v7 = vsel %vm1670_vm8, %v743_v3, 0.0 }
 0x173   : > { %v673_v9 = vadd.f32 %v670_v6, %v626_v40 }
 0x177   : > { %v785_v10 = vpop.permute.xlu1 %784  ;;  %v708_v20 = vpop.permute.xlu2 %707 }
 0x178   : > { %v791_v11 = vsel %vm788_vm13, %v785_v10, %v787_v51  ;;  %v768_v12 = vpop.permute.xlu0 %767 }
 0x179   : > { %v772_v17 = vmul.f32 %v768_v12, %v750_v43  ;;  %v797_v18 = vsel %vm1532_vm3, %v791_v11, 0.0 }
 0x17b   : > { %v775_v19 = vadd.f32 %v772_v17, %v728_v1 }
 0x17f   : > { %v714_v21 = vpop.permute.xlu1 %713  ;;  %v777_v23 = vpop.permute.xlu2 %776 }
 0x180   : > { %v712_v22 = vpop.permute.xlu0 %711 }
 0x181   : > { %v721_v14 = vsel %vm719_vm11, %v712_v22, %v714_v21 }
 0x182   : > { %v727_v15 = vadd.f32 %v721_v14, %v674_v55 }
 0x187   : > { %v763_v24 = vpop.permute.xlu1 %762  ;;  %v885_v28 = vpop.permute.xlu2 %884 }
 0x188   : > { %v771_v52 = vmul.f32 %v763_v24, %v749_v7  ;;  %v732_v13 = vpop.permute.xlu0 %731 }
 0x189   : > { %v742_v25 = vsel %vm741_vm12, %v730_v63, %v732_v13 }
 0x18a   : > { %v774_v33 = vadd.f32 %v771_v52, %v727_v15  ;;  %v748_v34 = vsel %vm1670_vm8, %v742_v25, 0.0 }
 0x18f   : > { %v815_v35 = vpop.permute.xlu1 %814  ;;  %v865_v37 = vpop.permute.xlu2 %864 }
 0x190   : > { %v819_v36 = vmul.f32 %v815_v35, %v797_v18  ;;  %v783_v29 = vpop.permute.xlu0 %782 }
 0x191   : > { %v790_v44 = vsel %vm788_vm13, %v781_v8, %v783_v29  ;;  %v982_v8 = vld.sshfl [vmem:[#allocation1] sm:$0xff pattern:$0x75316420] }
 0x192   : > { %v822_v38 = vadd.f32 %v819_v36, %v775_v19  ;;  %v796_v61 = vsel %vm1532_vm3, %v790_v44, 0.0  ;;  %984 = vrot.lane.b32.xlu1 %v982_v8, %s1325_s10 }
 0x197   : > { %v758_v39 = vpop.permute.xlu1 %757  ;;  %v883_v49 = vpop.permute.xlu2 %882 }
 0x198   : > { %v770_v27 = vmul.f32 %v758_v39, %v748_v34  ;;  %v710_v40 = vpop.permute.xlu0 %709 }
 0x199   : > { %v720_v42 = vsel %vm719_vm11, %v708_v20, %v710_v40 }
 0x19a   : > { %v726_v5 = vadd.f32 %v720_v42, %v673_v9  ;;  %v983_v9 = vld.sshfl [vmem:[#allocation1 + $0x8] sm:$0xff pattern:$0x75316420] }
 0x19b   : > { %986 = vrot.lane.b32.xlu2 %v983_v9, %s1325_s10 }
 0x19c   : > { %v773_v45 = vadd.f32 %v770_v27, %v726_v5 }
 0x19f   : > { %v810_v32 = vpop.permute.xlu1 %809  ;;  %v861_v41 = vpop.permute.xlu2 %860 }
 0x1a0   : > { %v818_v47 = vmul.f32 %v810_v32, %v796_v61  ;;  %v779_v60 = vpop.permute.xlu0 %778 }
 0x1a1   : > { %v789_v16 = vsel %vm788_vm13, %v777_v23, %v779_v60 }
 0x1a2   : > { %v821_v48 = vadd.f32 %v818_v47, %v774_v33  ;;  %v795_v59 = vsel %vm1532_vm3, %v789_v16, 0.0 }
 0x1a7   : > { %v863_v26 = vpop.permute.xlu1 %862  ;;  %v910_v0 = vpop.permute.xlu2 %909 }
 0x1a8   : > { %v887_v50 = vpop.permute.xlu0 %886  ;;  %v869_v58 = vsel %vm866_vm15, %v863_v26, %v865_v37 }
 0x1a9   : > { %v891_v57 = vsel %vm888_vm14, %v885_v28, %v887_v50  ;;  %v875_v43 = vadd.f32 %v869_v58, %v822_v38  ;;  %v950_v38 = vld [vmem:[%s1844_s5] sm:$0xf] }
 0x1aa   : > { %v897_v46 = vsel %vm1670_vm8, %v891_v57, 0.0 }
 0x1af   : > { %v881_v51 = vpop.permute.xlu1 %880  ;;  %v905_v17 = vpop.permute.xlu2 %904 }
 0x1b0   : > { %v805_v53 = vpop.permute.xlu0 %804  ;;  %v890_v55 = vsel %vm888_vm14, %v881_v51, %v883_v49 }
 0x1b1   : > { %v817_v54 = vmul.f32 %v805_v53, %v795_v59  ;;  %v896_v62 = vsel %vm1670_vm8, %v890_v55, 0.0 }
 0x1b2   : > { %v918_v31 = vmul.f32 %v910_v0, %v896_v62 }
 0x1b3   : > { %v820_v56 = vadd.f32 %v817_v54, %v773_v45 }
 0x1b7   : > { %v859_v63 = vpop.permute.xlu1 %858  ;;  %v929_v24 = vpop.permute.xlu2 %928 }
 0x1b8   : > { %v868_v1 = vsel %vm866_vm15, %v859_v63, %v861_v41  ;;  %v915_v2 = vpop.permute.xlu0 %914 }
 0x1b9   : > { %v874_v3 = vadd.f32 %v868_v1, %v821_v48  ;;  %v919_v4 = vmul.f32 %v915_v2, %v897_v46 }
 0x1bb   : > { %v921_v6 = vadd.f32 %v918_v31, %v874_v3  ;;  %v922_v7 = vadd.f32 %v919_v4, %v875_v43 }
 0x1bf   : > { %v879_v10 = vpop.permute.xlu1 %878 }
 0x1c0   : > { %v877_v11 = vpop.permute.xlu0 %876 }
 0x1c1   : > { %v889_v12 = vsel %vm888_vm14, %v877_v11, %v879_v10 }
 0x1c2   : > { %v895_v18 = vsel %vm1670_vm8, %v889_v12, 0.0 }
 0x1c3   : > { %v917_v22 = vmul.f32 %v905_v17, %v895_v18 }
 0x1c7   : > { %v857_v19 = vpop.permute.xlu1 %856 }
 0x1c8   : > { %v855_v20 = vpop.permute.xlu0 %854 }
 0x1c9   : > { %v867_v21 = vsel %vm866_vm15, %v855_v20, %v857_v19 }
 0x1ca   : > { %v873_v14 = vadd.f32 %v867_v21, %v820_v56 }
 0x1cc   : > { %v920_v15 = vadd.f32 %v917_v22, %v873_v14 }
 0x1ce   : > { %v941_v33 = vadd.f32 %v929_v24, %v920_v15 }
 0x1cf   : > { %v934_v23 = vpop.permute.xlu1 %933 }
 0x1d0   : > { %v942_v52 = vadd.f32 %v934_v23, %v921_v6  ;;  %v939_v13 = vpop.permute.xlu0 %938  ;;  %v944_v28 = vmax.f32 %v941_v33, 0.0 }
 0x1d1   : > { %v943_v25 = vadd.f32 %v939_v13, %v922_v7 }
 0x1d2   : > { %v945_v34 = vmax.f32 %v942_v52, 0.0  ;;  %v947_v29 = vmin.f32 %v944_v28, 6.0 }
 0x1d3   : > { %v946_v35 = vmax.f32 %v943_v25, 0.0 }
 0x1d4   : > { %v948_v36 = vmin.f32 %v945_v34, 6.0 }
 0x1d5   : > { %v949_v30 = vmin.f32 %v946_v35, 6.0 }
 0x1d7   : > { %974 = vmatpush.msra.mxu0 %v949_v30 }
 0x1d8   : > { %v955_v40 = vpop.permute.xlu0 %954 }
 0x1d9   : > { %975 = vmatpush.msra.mxu0 %v948_v36 }
 0x1db   : > { %976 = vmatpush.msra.mxu0 %v947_v29 }
 0x1dc   : > { %1119 = vmatmul.msk.f32.vlgmr.msra.gmra.mxu0 %vm957_vm0, %v950_v38 }
 0x1f5   : > { %v987_v27 = vpop.permute.xlu2 %986 }
 0x204   : > { %v985_v39 = vpop.permute.xlu1 %984 }
 0x205   : > { %v988_v37 = vsel %vm719_vm11, %v985_v39, %v987_v27 }
 0x259   : > { %v978_v42 = vpop.f32.mrf.mxu0 }
 0x25a   : > { %v979_v5 = vadd.f32 %v978_v42, %v955_v40 }
 0x25c   : > { %v990_v44 = vadd.f32 %v988_v37, %v979_v5 }
 0x25e   : > { %991 = vst [vmem:[%s285_s30] sm:$0xf] %v990_v44 }
 0x25f   : > { %1248 = shalt.err (!%p1245_p6)
}
 0x260   : > { %1126 = dma.vmem_to_hbm [thread:$0]  (%p1420_p3), %s1008_s11, 64, %s1010_s13, %s993_s27  }
 0x261 PF: > { %p1132_p7 = scmp.ge.s32.totalorder %s1315_s8, 2  ;;  %s1021_s22 = sand.u32 1, %s1287_s24  }
 0x262   : > { %s1022_s23 = scalar_lea.sflag [#allocation3], %s1021_s22 }
 0x263   : > { %p1129_p9 = pnand %p1132_p7, %p1429_p8 }
 0x265   : > { %p1130_p10 = pneg %p1129_p9 }
 0x267   : > { %1282 = dma.done.wait (%p1130_p10), %s1022_s23, 64  }
 0x268   : > { %1284 = vsyncadd (%p1130_p10), %s1022_s23, 4294967232  ;;  %s20_s8 = sadd.s32 1, %s1315_s8   ;;  %s1867_s28 = sld [smem:[#allocation5_spill]] }
 0x269   : > { %p17_p11 = scmp.ge.s32.totalorder %s20_s8, 6   ;;  %s1868_s14 = sld [smem:[#allocation6_spill]] }
 0x26a   : > { %s1869_s30 = sld [smem:[#allocation7_spill]]  ;;  %s1870_s24 = smov %s1291_s25 }
 0x26b   : > { %s1871_s25 = smov %s1295_s26  ;;  %s1872_s26 = smov %s1438_s19 }
 0x26c   : > { %s1873_s27 = smov %s1307_s29  ;;  %19 = sbr.rel (!%p17_p11) target bundleno = 8 (0x8), region = 92 }
 0x26f   : > { %s1874_s29 = smov %s1868_s14 }
 0x271   :  { %1028 = vsyncpa [#allocation3], 1 }
 0x272   :  { %1030 = vsyncpa [#allocation3 + $0x1], 1 }

// kernel: tpu_custom_call.1
= control target key start
LH: loop header
LB: loop body
LE: loop exit
PB: predicated region body
PF: predicated region fallthrough
CT: control target
= control target key end

     0   :  { %s1839_s0 = inlined_call_operand.vmem [shape: f32[2,4,290], index: 0, kind: input, shape index: {}]   ;;  %s1840_s1 = inlined_call_operand.vmem [shape: f32[24,4], index: 1, kind: input, shape index: {}]   ;;  %s1841_s2 = inlined_call_operand.vmem [shape: f32[24,1], index: 2, kind: input, shape index: {}]   ;;  %s1842_s3 = inlined_call_operand.vmem [shape: f32[9,24,1], index: 3, kind: input, shape index: {}]   ;;  %s1843_s4 = inlined_call_operand.vmem [shape: f32[24,1], index: 4, kind: input, shape index: {}]   ;;  %s1844_s5 = inlined_call_operand.vmem [shape: f32[4,24], index: 5, kind: input, shape index: {}]   ;;  %s1845_s6 = inlined_call_operand.vmem [shape: f32[4,1], index: 6, kind: input, shape index: {}]   ;;  %s1846_s7 = inlined_call_operand.hbm [shape: f32[2,4,256], index: 7, kind: output, shape index: {}]  }
   0x1   :  { %1850 = sst [smem:[#allocation8_spill]] %s1840_s1 }
   0x2   :  { %1851 = sst [smem:[#allocation9_spill]] %s1841_s2 }
   0x3   :  { %12 = vsyncpa [#allocation3], 0 }
   0x4   :  { %14 = vsyncpa [#allocation3 + $0x1], 0  ;;  %s1369_s24 = smov 0   ;;  %s1371_s25 = smov 0  }
   0x5   :  { %s1373_s26 = smov 0   ;;  %s1375_s27 = smov 0  }
   0x6   :  { %s1377_s28 = smov 0   ;;  %s1379_s29 = smov 0  }
   0x7   :  { %s1381_s30 = smov 0   ;;  %s1383_s8 = smov 0  }
   0x8 LB: > { %1852 = sst [smem:[#allocation5_spill]] %s1311_s30  ;;  %s1084_s9 = sadd.s32 4294967295, %s1315_s8   ;;  %s1315_s8 = sphi %s1383_s8, %s20_s8   ;;  %s1311_s30 = sphi %s1381_s30, %s1869_s30   ;;  %s1307_s29 = sphi %s1379_s29, %s1874_s29   ;;  %s1303_s28 = sphi %s1377_s28, %s1867_s28   ;;  %s1299_s27 = sphi %s1375_s27, %s1873_s27   ;;  %s1295_s26 = sphi %s1373_s26, %s1872_s26   ;;  %s1291_s25 = sphi %s1371_s25, %s1871_s25   ;;  %s1287_s24 = sphi %s1369_s24, %s1870_s24  }
   0x9   : > { %s1085_s10 = sadd.s32 4294967294, %s1315_s8   ;;  %s29_s11 = sadd.s32 1, %s1307_s29 }
   0xa   : > { %p30_p0 = scmp.ge.s32.totalorder %s29_s11, 2  ;;  %s32_s12 = sadd.s32 1, %s1311_s30 }
   0xb   : > { %p203_p1 = scmp.ne.s32.totalorder %s1295_s26, %s1291_s25  ;;  %p204_p2 = scmp.eq.s32.totalorder %s1084_s9, 3 }
   0xc   : > { %s1876_s11 = smov (%p30_p0, %s29_s11), 0  ;;  %s1878_s12 = smov (!%p30_p0, %s32_s12), %s1311_s30 }
   0xd   : > { %1853 = sst [smem:[#allocation6_spill]] %s1876_s11  ;;  %s189_s13 = ssub.s32 %s1307_s29, %s1876_s11 }
   0xe   : > { %p1420_p3 = por %p204_p2, %p203_p1  ;;  %p34_p4 = scmp.ge.s32.totalorder %s1878_s12, 2 }
   0xf   : > { %p209_p5 = scmp.ne.s32.totalorder %s1291_s25, %s1287_s24  ;;  %p210_p6 = scmp.eq.s32.totalorder %s1085_s10, 3 }
  0x10   : > { %p1088_p7 = scmp.ge.s32.totalorder %s1315_s8, 1  ;;  %s1880_s12 = smov (%p34_p4, %s1878_s12), 0 }
  0x11   : > { %1855 = sst [smem:[#allocation7_spill]] %s1880_s12  ;;  %p1429_p8 = por %p210_p6, %p209_p5 }
  0x12   : > { %p254_p9 = scmp.lt.s32.totalorder %s1315_s8, 5  ;;  %s188_s16 = ssub.s32 %s1311_s30, %s1880_s12 }
  0x13   : > { %s193_s17 = sadd.s32 1, %s1295_s26  ;;  %s190_s18 = sor.u32 %s189_s13, %s188_s16 }
  0x14   : > { %p255_p10 = pnand %p1088_p7, %p254_p9  ;;  %p191_p11 = scmp.eq.s32.totalorder %s190_s18, 0 }
  0x15   : > { %s1857_s1 = sld [smem:[#allocation8_spill]] (!%p255_p10)  ;;  %p286_p12 = scmp.lt.s32.totalorder (!%p255_p10), %s1303_s28, 1 }
  0x16   : > { %s1438_s19 = scalar_select %p191_p11, %s1295_s26, %s193_s17  }
  0x17   : > { %258 = sbr.rel (%p255_p10) target bundleno = 609 (0x261), region = 48  ;;  %s1858_s2 = sld [smem:[#allocation9_spill]] (!%p255_p10) }
  0x18   : > { %s1091_s18 = sshll.u32 (!%p255_p10), %s1299_s27, 7  ;;  %s1322_s23 = smov (!%p255_p10), 112  }
  0x19   : > { %s292_s10 = sshra.s32 (!%p255_p10), %s1091_s18, 7  ;;  %s1328_s13 = smov (!%p255_p10), 95  }
  0x1a   : > { %s1092_s11 = sshll.u32 (!%p255_p10), %s292_s10, 2  ;;  %s1325_s10 = smov (!%p255_p10), 111  }
  0x1b   : > { %s283_s22 = sand.u32 (!%p255_p10), 1, %s1291_s25   ;;  %s1241_s21 = scalar_lea.hbm (!%p255_p10), %s1846_s7, 16 }
  0x1c   : > { %v299_v0 = vld [vmem:[%s1857_s1 + $0x10] sm:$0xff]  ;;  %v298_v1 = vld [vmem:[%s1857_s1 + $0x8] sm:$0xff]  ;;  %v297_v2 = vld [vmem:[%s1857_s1] sm:$0xff]  ;;  %v1317_v3 = vmov 2   ;;  %v1318_v4 = vmov 1   ;;  %v1319_v5 = vmov 0   ;;  %v454_v35 = vlaneseq }
  0x1d   : > { %1212 = vset.pattern.permute.xlu0 %v1317_v3  ;;  %1211 = vset.pattern.permute.xlu2 %v1318_v4  ;;  %v1320_v6 = vmov 3   ;;  %v498_v7 = vld [vmem:[%s1842_s3 + $0x8] sm:$0xff]  ;;  %v418_v9 = vld [vmem:[%s1858_s2] sm:$0xff]  ;;  %v1098_v10 = vld [vmem:[%s1842_s3 + $0x30] sm:$0xff]  ;;  %s287_s17 = scalar_select %p286_p12, %s1303_s28, 1  ;;  %v457_v46 = vstv %s1091_s18  ;;  %vm594_vm7 = vcmask 1031168  }
  0x1e   : > { %1209 = vset.pattern.permute.xlu1 %v1319_v5  ;;  %333 = vperm.xlu2 %1211, %v298_v1   ;;  %v419_v8 = vld [vmem:[%s1858_s2 + $0x8] sm:$0xff]  ;;  %v497_v11 = vld [vmem:[%s1842_s3] sm:$0xff]  ;;  %v420_v12 = vld [vmem:[%s1858_s2 + $0x10] sm:$0xff]  ;;  %v1515_v43 = vand.u32 127, %v454_v35  ;;  %s1321_s18 = smov 126   ;;  %s1323_s1 = smov 127  }
  0x1f   : > { %312 = vperm.xlu1 %1209, %v299_v0   ;;  %359 = vperm.xlu0 %1212, %v297_v2   ;;  %v1105_v13 = vld [vmem:[%s1842_s3 + $0x68] sm:$0xff]  ;;  %v1095_v14 = vld [vmem:[%s1842_s3 + $0x18] sm:$0xff]  ;;  %s1125_s9 = smul.u32 12, %s287_s17  ;;  %v499_v15 = vld [vmem:[%s1842_s3 + $0x10] sm:$0xff]  ;;  %s1326_s17 = smov 96   ;;  %vm641_vm9 = vcmask 916480  }
  0x20   : > { %v1114_v16 = vld [vmem:[%s1842_s3 + $0xb0] sm:$0xff]  ;;  %v1097_v17 = vld [vmem:[%s1842_s3 + $0x28] sm:$0xff]  ;;  %v1096_v18 = vld [vmem:[%s1842_s3 + $0x20] sm:$0xff]  ;;  %v458_v59 = vadd.s32 %v457_v46, %v1515_v43  ;;  %v456_v60 = vadd.s32 128, %v1515_v43  ;;  %vm564_vm10 = vcmask 1039360   ;;  %vm719_vm11 = vcmask 908288  }
  0x21   : > { %s290_s2 = scalar_lea.vmem %s1839_s0, %s1125_s9  ;;  %v1100_v20 = vld [vmem:[%s1842_s3 + $0x40] sm:$0xff]  ;;  %v1099_v21 = vld [vmem:[%s1842_s3 + $0x38] sm:$0xff]  ;;  %v1106_v22 = vld [vmem:[%s1842_s3 + $0x70] sm:$0xff]  ;;  %vm741_vm12 = vcmask 900096   ;;  %vm788_vm13 = vcmask 785408   ;;  %vm888_vm14 = vcmask 769024  }
  0x22   : > { %s295_s20 = scalar_lea.vmem %s290_s2, %s1092_s11  ;;  %v1104_v23 = vld [vmem:[%s1842_s3 + $0x60] sm:$0xff]  ;;  %v1115_v24 = vld [vmem:[%s1842_s3 + $0xb8] sm:$0xff]  ;;  %v1113_v25 = vld [vmem:[%s1842_s3 + $0xa8] sm:$0xff]  ;;  %s1324_s11 = smov 110   ;;  %vm866_vm15 = vcmask 777216  }
  0x23   : > { %v296_v19 = vld [vmem:[%s295_s20] sm:$0xff] }
  0x24   : > { %981 = vst [vmem:[#allocation1] ss:$2 sm:$0xff] %v296_v19  ;;  %v316_v36 = vperm.slane %v296_v19, 0  ;;  %v317_v37 = vperm.slane %v296_v19, 4  ;;  %v340_v38 = vperm.slane %v296_v19, 1  ;;  %v341_v39 = vperm.slane %v296_v19, 5 }
  0x25   : > { %v370_v40 = vperm.slane %v296_v19, 2  ;;  %v371_v41 = vperm.slane %v296_v19, 6  ;;  %v400_v42 = vperm.slane %v296_v19, 3  ;;  %v401_v51 = vperm.slane %v296_v19, 7 }
  0x26   : > { %337 = vperm.xlu2 %1211, %v299_v0   ;;  %v320_v44 = vperm.slane %v316_v36, 0  ;;  %v321_v45 = vperm.slane %v317_v37, 0  ;;  %v344_v47 = vperm.slane %v340_v38, 1  ;;  %v345_v48 = vperm.slane %v341_v39, 1 }
  0x27   : > { %1210 = vset.pattern.permute.xlu1 %v1318_v4  ;;  %1217 = vset.pattern.permute.xlu0 %v1320_v6  ;;  %v374_v49 = vperm.slane %v370_v40, 2  ;;  %v375_v52 = vperm.slane %v371_v41, 2  ;;  %v404_v53 = vperm.slane %v400_v42, 3 }
  0x28   : > { %397 = vperm.xlu0 %1217, %v299_v0   ;;  %329 = vperm.xlu1 %1210, %v297_v2  }
  0x2e   : > { %1214 = vset.pattern.permute.xlu2 %v1317_v3 }
  0x2f   : > { %367 = vperm.xlu2 %1214, %v299_v0  }
  0x30   : > { %1218 = vset.pattern.permute.xlu0 %v1319_v5  ;;  %1213 = vset.pattern.permute.xlu1 %v1317_v3  ;;  %v405_v3 = vperm.slane %v401_v51, 3 }
  0x31   : > { %302 = vperm.xlu0 %1218, %v297_v2   ;;  %363 = vperm.xlu1 %1213, %v298_v1  }
  0x37   : > { %1216 = vset.pattern.permute.xlu2 %v1320_v6 }
  0x38   : > { %393 = vperm.xlu2 %1216, %v298_v1  }
  0x39   : > { %307 = vperm.xlu0 %1218, %v298_v1   ;;  %1215 = vset.pattern.permute.xlu1 %v1320_v6 }
  0x3a   : > { %389 = vperm.xlu1 %1215, %v297_v2  }
  0x40   : > { %1220 = vset.pattern.permute.xlu2 %v1319_v5 }
  0x41   : > { %507 = vperm.xlu0 %1218, %v498_v7   ;;  %428 = vperm.xlu2 %1220, %v419_v8  }
  0x42   : > { %1219 = vset.pattern.permute.xlu1 %v1319_v5 }
  0x43   : > { %423 = vperm.xlu1 %1219, %v418_v9  }
  0x49   : > { %610 = vperm.xlu0 %1218, %v1098_v10   ;;  %502 = vperm.xlu2 %1220, %v497_v11  }
  0x4b   : > { %433 = vperm.xlu1 %1219, %v420_v12   ;;  %v1093_v12 = vadd.s32 4294967279, %v458_v59 }
  0x4d   : > { %vm462_vm0 = vcmp.ge.s32.totalorder %v1093_v12, 0  ;;  %vm464_vm1 = vcmp.lt.s32.totalorder %v1093_v12, 256 }
  0x4e   : > { %vm1526_vm2 = vmand %vm462_vm0, %vm464_vm1  ;;  %vm957_vm0 = vcmask 195584  }
  0x51   : > { %687 = vperm.xlu0 %1218, %v1105_v13   ;;  %527 = vperm.xlu2 %1220, %v1095_v14   ;;  %v459_v13 = vadd.s32 %v457_v46, %v456_v60 }
  0x53   : > { %512 = vperm.xlu1 %1219, %v499_v15  }
  0x59   : > { %834 = vperm.xlu0 %1218, %v1114_v16   ;;  %537 = vperm.xlu2 %1220, %v1097_v17  }
  0x5b   : > { %532 = vperm.xlu1 %1219, %v1096_v18  }
  0x61   : > { %620 = vperm.xlu2 %1220, %v1100_v20  }
  0x63   : > { %615 = vperm.xlu1 %1219, %v1099_v21  }
  0x69   : > { %692 = vperm.xlu2 %1220, %v1106_v22  }
  0x6b   : > { %682 = vperm.xlu1 %1219, %v1104_v23  }
  0x71   : > { %839 = vperm.xlu2 %1220, %v1115_v24  }
  0x73   : > { %829 = vperm.xlu1 %1219, %v1113_v25  }
  0x78   : > { %v334_v26 = vpop.permute.xlu2 %333 }
  0x79   : > { %v348_v56 = vmul.f32 %v344_v47, %v334_v26  ;;  %v349_v57 = vmul.f32 %v345_v48, %v334_v26 }
  0x80   : > { %v338_v29 = vpop.permute.xlu2 %337 }
  0x81   : > { %v350_v2 = vmul.f32 %v344_v47, %v338_v29  ;;  %v351_v18 = vmul.f32 %v345_v48, %v338_v29 }
  0x89   : > { %v1513_v32 = vpop.permute.xlu2 %367 }
  0x8a   : > { %v380_v36 = vmul.f32 %v374_v49, %v1513_v32  ;;  %v381_v29 = vmul.f32 %v375_v52, %v1513_v32 }
  0x91   : > { %v313_v27 = vpop.permute.xlu1 %312  ;;  %v360_v28 = vpop.permute.xlu0 %359 }
  0x92   : > { %v394_v50 = vpop.permute.xlu2 %393  ;;  %v376_v10 = vmul.f32 %v374_v49, %v360_v28  ;;  %v377_v14 = vmul.f32 %v375_v52, %v360_v28  ;;  %v326_v19 = vmul.f32 %v320_v44, %v313_v27  ;;  %v327_v22 = vmul.f32 %v321_v45, %v313_v27 }
  0x93   : > { %v408_v4 = vmul.f32 %v404_v53, %v394_v50  ;;  %v409_v20 = vmul.f32 %v405_v3, %v394_v50 }
  0x94   : > { %v356_v37 = vadd.f32 %v350_v2, %v326_v19  ;;  %v357_v27 = vadd.f32 %v351_v18, %v327_v22 }
  0x96   : > { %v386_v51 = vadd.f32 %v380_v36, %v356_v37 }
  0x9a   : > { %v1511_v30 = vpop.permute.xlu0 %397  ;;  %v330_v31 = vpop.permute.xlu1 %329 }
  0x9b   : > { %v346_v61 = vmul.f32 %v344_v47, %v330_v31  ;;  %v347_v62 = vmul.f32 %v345_v48, %v330_v31  ;;  %v429_v26 = vpop.permute.xlu2 %428  ;;  %v482_v31 = vand.u32 15, %v1515_v43  ;;  %v411_v32 = vmul.f32 %v405_v3, %v1511_v30 }
  0x9d   : > { %vm1532_vm3 = vcmp.gt.s32.totalorder %v482_v31, 0  ;;  %vm1670_vm8 = vcmp.lt.s32.totalorder %v482_v31, 15 }
  0xa3   : > { %v303_v33 = vpop.permute.xlu0 %302  ;;  %v364_v34 = vpop.permute.xlu1 %363 }
  0xa4   : > { %v322_v54 = vmul.f32 %v320_v44, %v303_v33  ;;  %v323_v55 = vmul.f32 %v321_v45, %v303_v33  ;;  %v378_v5 = vmul.f32 %v374_v49, %v364_v34  ;;  %v379_v11 = vmul.f32 %v375_v52, %v364_v34 }
  0xa5   : > { %v1094_v33 = vadd.s32 4294967279, %v459_v13 }
  0xa6   : > { %v352_v6 = vadd.f32 %v346_v61, %v322_v54  ;;  %v353_v7 = vadd.f32 %v347_v62, %v323_v55  ;;  %v387_v55 = vadd.f32 %v381_v29, %v357_v27  ;;  %v1101_v29 = vld [vmem:[%s1842_s3 + $0x48] sm:$0xff] }
  0xa7   : > { %vm463_vm4 = vcmp.ge.s32.totalorder %v1094_v33, 0  ;;  %vm465_vm5 = vcmp.lt.s32.totalorder %v1094_v33, 256  ;;  %v1102_v33 = vld [vmem:[%s1842_s3 + $0x50] sm:$0xff] }
  0xa8   : > { %v382_v24 = vadd.f32 %v376_v10, %v352_v6  ;;  %v383_v25 = vadd.f32 %v377_v14, %v353_v7  ;;  %vm1544_vm6 = vmand %vm463_vm4, %vm465_vm5  ;;  %v417_v62 = vadd.f32 %v411_v32, %v387_v55 }
  0xab   : > { %v308_v58 = vpop.permute.xlu0 %307 }
  0xac   : > { %v324_v63 = vmul.f32 %v320_v44, %v308_v58  ;;  %v325_v0 = vmul.f32 %v321_v45, %v308_v58  ;;  %v390_v1 = vpop.permute.xlu1 %389  ;;  %v410_v44 = vmul.f32 %v404_v53, %v1511_v30 }
  0xad   : > { %v406_v16 = vmul.f32 %v404_v53, %v390_v1  ;;  %v407_v17 = vmul.f32 %v405_v3, %v390_v1 }
  0xae   : > { %v354_v8 = vadd.f32 %v348_v56, %v324_v63  ;;  %v355_v9 = vadd.f32 %v349_v57, %v325_v0  ;;  %v416_v30 = vadd.f32 %v410_v44, %v386_v51  ;;  %v503_v63 = vpop.permute.xlu2 %502  ;;  %v1108_v44 = vld [vmem:[%s1842_s3 + $0x80] sm:$0xff] }
  0xaf   : > { %v412_v35 = vadd.f32 %v406_v16, %v382_v24  ;;  %v413_v28 = vadd.f32 %v407_v17, %v383_v25 }
  0xb0   : > { %v384_v15 = vadd.f32 %v378_v5, %v354_v8  ;;  %v385_v21 = vadd.f32 %v379_v11, %v355_v9 }
  0xb2   : > { %v414_v23 = vadd.f32 %v408_v4, %v384_v15  ;;  %v415_v38 = vadd.f32 %v409_v20, %v385_v21 }
  0xb3   : > { %v508_v56 = vpop.permute.xlu0 %507 }
  0xb4   : > { %v438_v34 = vadd.f32 %v429_v26, %v414_v23  ;;  %v439_v50 = vadd.f32 %v429_v26, %v415_v38  ;;  %v1109_v38 = vld [vmem:[%s1842_s3 + $0x88] sm:$0xff] }
  0xb5   : > { %v424_v39 = vpop.permute.xlu1 %423 }
  0xb6   : > { %v444_v40 = vmax.f32 %v438_v34, 0.0  ;;  %v436_v41 = vadd.f32 %v424_v39, %v412_v35  ;;  %v437_v42 = vadd.f32 %v424_v39, %v413_v28  ;;  %v445_v0 = vmax.f32 %v439_v50, 0.0  ;;  %v528_v17 = vpop.permute.xlu2 %527  ;;  %v1103_v34 = vld [vmem:[%s1842_s3 + $0x58] sm:$0xff] }
  0xb7   : > { %v1107_v50 = vld [vmem:[%s1842_s3 + $0x78] sm:$0xff] }
  0xb8   : > { %v450_v47 = vmin.f32 %v444_v40, 6.0  ;;  %v442_v48 = vmax.f32 %v436_v41, 0.0  ;;  %v443_v49 = vmax.f32 %v437_v42, 0.0  ;;  %v451_v8 = vmin.f32 %v445_v0, 6.0 }
  0xba   : > { %v1539_v52 = vsel %vm1526_vm2, %v450_v47, 0.0  ;;  %v448_v53 = vmin.f32 %v442_v48, 6.0  ;;  %v449_v54 = vmin.f32 %v443_v49, 6.0  ;;  %v1576_v13 = vsel %vm1544_vm6, %v451_v8, 0.0  ;;  %v1112_v47 = vld [vmem:[%s1842_s3 + $0xa0] sm:$0xff] }
  0xbb   : > { %v495_v57 = vsel %vm1532_vm3, %v1539_v52, 0.0  ;;  %586 = vrot.lane.b32.xlu2 %v1539_v52, %s1321_s18  ;;  %v1621_v37 = vpop.permute.xlu0 %610 }
  0xbc   : > { %v1549_v59 = vmul.f32 %v508_v56, %v495_v57  ;;  %v1553_v60 = vsel %vm1526_vm2, %v448_v53, 0.0  ;;  %v1557_v61 = vsel %vm1544_vm6, %v449_v54, 0.0  ;;  %v1111_v56 = vld [vmem:[%s1842_s3 + $0x98] sm:$0xff] }
  0xbd   : > { %v434_v1 = vpop.permute.xlu1 %433  ;;  %584 = vrot.lane.b32.xlu1 %v1557_v61, %s1321_s18  ;;  %582 = vrot.lane.b32.xlu0 %v1553_v60, %s1321_s18  ;;  %v494_v2 = vsel %vm1532_vm3, %v1553_v60, 0.0  ;;  %v541_v20 = vmul.f32 %v528_v17, %v1557_v61  ;;  %v540_v22 = vmul.f32 %v528_v17, %v1553_v60 }
  0xbe   : > { %v440_v3 = vadd.f32 %v434_v1, %v416_v30  ;;  %v441_v4 = vadd.f32 %v434_v1, %v417_v62  ;;  %v1564_v5 = vmul.f32 %v503_v63, %v494_v2  ;;  %v538_v21 = vpop.permute.xlu2 %537 }
  0xc0   : > { %v446_v6 = vmax.f32 %v440_v3, 0.0  ;;  %v447_v7 = vmax.f32 %v441_v4, 0.0 }
  0xc2   : > { %v452_v9 = vmin.f32 %v446_v6, 6.0  ;;  %v453_v10 = vmin.f32 %v447_v7, 6.0 }
  0xc3   : > { %v688_v39 = vpop.permute.xlu0 %687 }
  0xc4   : > { %v1568_v11 = vsel %vm1526_vm2, %v452_v9, 0.0  ;;  %v1572_v12 = vsel %vm1544_vm6, %v453_v10, 0.0  ;;  %v698_v27 = vmul.f32 %v688_v39, %v1576_v13  ;;  %v697_v40 = vmul.f32 %v688_v39, %v1539_v52  ;;  %v1110_v9 = vld [vmem:[%s1842_s3 + $0x90] sm:$0xff] }
  0xc5   : > { %v513_v14 = vpop.permute.xlu1 %512  ;;  %v496_v15 = vsel %vm1532_vm3, %v1568_v11, 0.0  ;;  %590 = vrot.lane.b32.xlu1 %v1568_v11, %s1321_s18  ;;  %592 = vrot.lane.b32.xlu2 %v1572_v12, %s1321_s18  ;;  %v544_v23 = vmul.f32 %v538_v21, %v1568_v11  ;;  %v545_v24 = vmul.f32 %v538_v21, %v1572_v12 }
  0xc6   : > { %v1583_v16 = vmul.f32 %v513_v14, %v496_v15  ;;  %588 = vrot.lane.b32.xlu0 %v1576_v13, %s1321_s18  ;;  %v1598_v26 = vpop.permute.xlu2 %620 }
  0xcb   : > { %v835_v55 = vpop.permute.xlu0 %834 }
  0xcc   : > { %v844_v17 = vmul.f32 %v835_v55, %v1539_v52 }
  0xcd   : > { %631 = vrot.lane.b32.xlu1 %v1557_v61, %s1322_s23  ;;  %633 = vrot.lane.b32.xlu2 %v1539_v52, %s1322_s23  ;;  %v533_v18 = vpop.permute.xlu1 %532 }
  0xce   : > { %629 = vrot.lane.b32.xlu0 %v1553_v60, %s1322_s23  ;;  %v542_v19 = vmul.f32 %v533_v18, %v1539_v52  ;;  %v543_v25 = vmul.f32 %v533_v18, %v1576_v13  ;;  %v693_v35 = vpop.permute.xlu2 %692  ;;  %v845_v18 = vmul.f32 %v835_v55, %v1576_v13 }
  0xcf   : > { %v699_v28 = vmul.f32 %v693_v35, %v1568_v11  ;;  %v700_v36 = vmul.f32 %v693_v35, %v1572_v12 }
  0xd5   : > { %637 = vrot.lane.b32.xlu1 %v1568_v11, %s1322_s23  ;;  %639 = vrot.lane.b32.xlu2 %v1572_v12, %s1322_s23  ;;  %v1635_v41 = vpop.permute.xlu1 %615 }
  0xd6   : > { %635 = vrot.lane.b32.xlu0 %v1576_v13, %s1322_s23  ;;  %v840_v42 = vpop.permute.xlu2 %839  ;;  %s1089_s23 = sshll.u32 %s283_s22, 2 }
  0xd7   : > { %v846_v1 = vmul.f32 %v840_v42, %v1568_v11  ;;  %v847_v2 = vmul.f32 %v840_v42, %v1572_v12  ;;  %s285_s30 = scalar_lea.vmem [#allocation2], %s1089_s23 }
  0xdd   : > { %554 = vrot.lane.b32.xlu1 %v541_v20, %s1323_s1  ;;  %556 = vrot.lane.b32.xlu2 %v542_v19, %s1323_s1  ;;  %v683_v32 = vpop.permute.xlu1 %682  ;;  %v1118_v19 = vld [vmem:[%s1842_s3 + $0xd0] sm:$0xff] }
  0xde   : > { %552 = vrot.lane.b32.xlu0 %v540_v22, %s1323_s1  ;;  %v695_v48 = vmul.f32 %v683_v32, %v1553_v60  ;;  %v696_v51 = vmul.f32 %v683_v32, %v1557_v61 }
  0xe5   : > { %560 = vrot.lane.b32.xlu1 %v544_v23, %s1323_s1  ;;  %562 = vrot.lane.b32.xlu2 %v545_v24, %s1323_s1  ;;  %v1659_v53 = vpop.permute.xlu1 %829 }
  0xe6   : > { %558 = vrot.lane.b32.xlu0 %v543_v25, %s1323_s1  ;;  %v843_v39 = vmul.f32 %v1659_v53, %v1557_v61 }
  0xed   : > { %662 = vperm.xlu1 %1219, %v1102_v33   ;;  %737 = vrot.lane.b32.xlu2 %v1568_v11, %s1324_s11 }
  0xee   : > { %667 = vperm.xlu0 %1218, %v1103_v34  }
  0xf5   : > { %715 = vrot.lane.b32.xlu1 %v699_v28, %s1325_s10  ;;  %717 = vrot.lane.b32.xlu2 %v700_v36, %s1325_s10 }
  0xf6   : > { %739 = vrot.lane.b32.xlu0 %v1572_v12, %s1324_s11 }
  0xfd   : > { %733 = vrot.lane.b32.xlu1 %v1539_v52, %s1324_s11  ;;  %735 = vrot.lane.b32.xlu2 %v1576_v13, %s1324_s11 }
  0xfe   : > { %657 = vperm.xlu0 %1218, %v1101_v29  }
 0x105   : > { %784 = vrot.lane.b32.xlu1 %v1568_v11, %s1326_s17  ;;  %786 = vrot.lane.b32.xlu2 %v1572_v12, %s1326_s17 }
 0x106   : > { %767 = vperm.xlu0 %1218, %v1109_v38   ;;  %v1116_v38 = vld [vmem:[%s1842_s3 + $0xc0] sm:$0xff] }
 0x10d   : > { %713 = vrot.lane.b32.xlu1 %v698_v27, %s1325_s10  ;;  %729 = vrot.lane.b32.xlu2 %v1553_v60, %s1324_s11  ;;  %v842_v27 = vmul.f32 %v1659_v53, %v1553_v60 }
 0x10e   : > { %711 = vrot.lane.b32.xlu0 %v697_v40, %s1325_s10 }
 0x115   : > { %762 = vperm.xlu1 %1219, %v1108_v44   ;;  %780 = vrot.lane.b32.xlu2 %v1539_v52, %s1326_s17  ;;  %v587_v45 = vpop.permute.xlu2 %586 }
 0x116   : > { %731 = vrot.lane.b32.xlu0 %v1557_v61, %s1324_s11  ;;  %s1327_s11 = smov 94  }
 0x11d   : > { %814 = vperm.xlu1 %1219, %v1112_v47   ;;  %707 = vrot.lane.b32.xlu2 %v695_v48, %s1325_s10  ;;  %v924_v48 = vld [vmem:[%s1843_s4 + $0x8] sm:$0xff] }
 0x11e   : > { %782 = vrot.lane.b32.xlu0 %v1576_v13, %s1326_s17 }
 0x11f   : > { %v593_v49 = vpop.permute.xlu2 %592 }
 0x125   : > { %757 = vperm.xlu1 %1219, %v1107_v50   ;;  %776 = vrot.lane.b32.xlu2 %v1553_v60, %s1326_s17 }
 0x126   : > { %709 = vrot.lane.b32.xlu0 %v696_v51, %s1325_s10 }
 0x127   : > { %v634_v54 = vpop.permute.xlu2 %633 }
 0x12d   : > { %809 = vperm.xlu1 %1219, %v1111_v56   ;;  %884 = vrot.lane.b32.xlu2 %v1568_v11, %s1327_s11 }
 0x12e   : > { %778 = vrot.lane.b32.xlu0 %v1557_v61, %s1326_s17  ;;  %s1121_s17 = sshll.u32 %s1303_s28, 1 }
 0x12f   : > { %v585_v57 = vpop.permute.xlu1 %584  ;;  %v640_v58 = vpop.permute.xlu2 %639  ;;  %s1003_s18 = sadd.s32 %s1299_s27, %s1121_s17  ;;  %s993_s27 = scalar_lea.sflag [#allocation3], %s283_s22 }
 0x130   : > { %v583_v62 = vpop.permute.xlu0 %582  ;;  %s1122_s1 = sshll.u32 %s1003_s18, 2 }
 0x131   : > { %v595_v63 = vsel %vm594_vm7, %v583_v62, %v585_v57  ;;  %v951_v57 = vld [vmem:[%s1845_s6] sm:$0xf]  ;;  %s1005_s2 = scalar_lea.hbm %s1846_s7, %s1122_s1 }
 0x132   : > { %v601_v0 = vsel %vm1670_vm8, %v595_v63, 0.0 }
 0x133   : > { %v623_v36 = vmul.f32 %v1621_v37, %v601_v0 }
 0x135   : > { %862 = vrot.lane.b32.xlu1 %v846_v1, %s1328_s13  ;;  %864 = vrot.lane.b32.xlu2 %v847_v2, %s1328_s13 }
 0x136   : > { %886 = vrot.lane.b32.xlu0 %v1572_v12, %s1327_s11 }
 0x137   : > { %v591_v43 = vpop.permute.xlu1 %590  ;;  %v557_v31 = vpop.permute.xlu2 %556 }
 0x138   : > { %v597_v3 = vsel %vm594_vm7, %v591_v43, %v593_v49  ;;  %v589_v4 = vpop.permute.xlu0 %588  ;;  %v923_v49 = vld [vmem:[%s1843_s4] sm:$0xff] }
 0x139   : > { %v603_v6 = vsel %vm1670_vm8, %v597_v3, 0.0  ;;  %v596_v7 = vsel %vm594_vm7, %v587_v45, %v589_v4 }
 0x13a   : > { %v602_v8 = vsel %vm1670_vm8, %v596_v7, 0.0  ;;  %v625_v45 = vmul.f32 %v1598_v26, %v603_v6  ;;  %v925_v26 = vld [vmem:[%s1843_s4 + $0x10] sm:$0xff] }
 0x13b   : > { %v624_v47 = vmul.f32 %v1635_v41, %v602_v8 }
 0x13d   : > { %880 = vrot.lane.b32.xlu1 %v1539_v52, %s1327_s11  ;;  %882 = vrot.lane.b32.xlu2 %v1576_v13, %s1327_s11  ;;  %v1117_v13 = vld [vmem:[%s1842_s3 + $0xc8] sm:$0xff] }
 0x13e   : > { %804 = vperm.xlu0 %1218, %v1110_v9  }
 0x13f   : > { %v632_v10 = vpop.permute.xlu1 %631  ;;  %v563_v11 = vpop.permute.xlu2 %562 }
 0x140   : > { %v630_v12 = vpop.permute.xlu0 %629 }
 0x141   : > { %v1697_v14 = vsel %vm641_vm9, %v630_v12, %v632_v10 }
 0x142   : > { %v648_v15 = vsel %vm1532_vm3, %v1697_v14, 0.0 }
 0x145   : > { %858 = vrot.lane.b32.xlu1 %v844_v17, %s1328_s13  ;;  %860 = vrot.lane.b32.xlu2 %v845_v18, %s1328_s13 }
 0x146   : > { %914 = vperm.xlu0 %1218, %v1118_v19  }
 0x147   : > { %v638_v20 = vpop.permute.xlu1 %637  ;;  %v738_v21 = vpop.permute.xlu2 %737 }
 0x148   : > { %v644_v22 = vsel %vm641_vm9, %v638_v20, %v640_v58  ;;  %v636_v23 = vpop.permute.xlu0 %635 }
 0x149   : > { %v643_v24 = vsel %vm641_vm9, %v634_v54, %v636_v23  ;;  %v650_v52 = vsel %vm1532_vm3, %v644_v22, 0.0 }
 0x14a   : > { %v649_v25 = vsel %vm1532_vm3, %v643_v24, 0.0 }
 0x14d   : > { %878 = vrot.lane.b32.xlu1 %v1557_v61, %s1327_s11  ;;  %909 = vperm.xlu2 %1220, %v1117_v13  }
 0x14e   : > { %876 = vrot.lane.b32.xlu0 %v1553_v60, %s1327_s11  ;;  %s1007_s11 = sshll.u32 %s285_s30, 4  ;;  %s1008_s11 = int_to_ptr.vmem [resolvable:$true] %s1007_s11 }
 0x14f   : > { %v555_v33 = vpop.permute.xlu1 %554  ;;  %v718_v34 = vpop.permute.xlu2 %717 }
 0x150   : > { %v553_v35 = vpop.permute.xlu0 %552 }
 0x151   : > { %v565_v28 = vsel %vm564_vm10, %v553_v35, %v555_v33 }
 0x152   : > { %v571_v29 = vadd.f32 %v565_v28, %v1564_v5 }
 0x154   : > { %v626_v40 = vadd.f32 %v623_v36, %v571_v29 }
 0x155   : > { %856 = vrot.lane.b32.xlu1 %v843_v39, %s1328_s13  ;;  %904 = vperm.xlu2 %1220, %v1116_v38  }
 0x156   : > { %854 = vrot.lane.b32.xlu0 %v842_v27, %s1328_s13  ;;  %s1009_s13 = sshll.u32 %s1005_s2, 4  ;;  %s1010_s13 = int_to_ptr.hbm [resolvable:$true] %s1009_s13 }
 0x157   : > { %v561_v42 = vpop.permute.xlu1 %560  ;;  %v736_v37 = vpop.permute.xlu2 %735  ;;  %s1235_s28 = sshra.s32 %s1010_s13, 4  ;;  %s1236_s28 = int_to_ptr.hbm [resolvable:$true] %s1235_s28 }
 0x158   : > { %v567_v5 = vsel %vm564_vm10, %v561_v42, %v563_v11  ;;  %v559_v44 = vpop.permute.xlu0 %558  ;;  %s1237_s16 = scalar_lea.hbm %s1236_s28, 4  ;;  %p1242_p2 = scmp.lt.s32.totalorder %s1236_s28, %s1846_s7 }
 0x159   : > { %v573_v32 = vadd.f32 %v567_v5, %v1583_v16  ;;  %v566_v61 = vsel %vm564_vm10, %v557_v31, %v559_v44  ;;  %p1238_p13 = scmp.ne.s32.totalorder %s1236_s28, %s1237_s16  ;;  %p1243_p4 = scmp.lt.s32.totalorder %s1241_s21, %s1237_s16 }
 0x15a   : > { %v572_v60 = vadd.f32 %v566_v61, %v1549_v59 }
 0x15b   : > { %v628_v50 = vadd.f32 %v625_v45, %v573_v32  ;;  %p1239_p0 = pnand %p1238_p13, %p1420_p3  ;;  %p1244_p5 = por %p1243_p4, %p1242_p2 }
 0x15c   : > { %v627_v16 = vadd.f32 %v624_v47, %v572_v60 }
 0x15d   : > { %933 = vperm.xlu1 %1219, %v924_v48   ;;  %928 = vperm.xlu2 %1220, %v923_v49   ;;  %p1240_p1 = pneg %p1239_p0 }
 0x15e   : > { %938 = vperm.xlu0 %1218, %v925_v26  }
 0x15f   : > { %v663_v41 = vpop.permute.xlu1 %662  ;;  %v787_v51 = vpop.permute.xlu2 %786  ;;  %p1245_p6 = pnand %p1244_p5, %p1240_p1 }
 0x160   : > { %v671_v59 = vmul.f32 %v663_v41, %v649_v25  ;;  %v668_v53 = vpop.permute.xlu0 %667 }
 0x161   : > { %v672_v54 = vmul.f32 %v668_v53, %v650_v52 }
 0x162   : > { %v674_v55 = vadd.f32 %v671_v59, %v627_v16 }
 0x163   : > { %v675_v56 = vadd.f32 %v672_v54, %v628_v50 }
 0x166   : > { %954 = vperm.xlu0 %1218, %v951_v57  }
 0x167   : > { %v716_v58 = vpop.permute.xlu1 %715  ;;  %v730_v63 = vpop.permute.xlu2 %729 }
 0x168   : > { %v722_v62 = vsel %vm719_vm11, %v716_v58, %v718_v34  ;;  %v740_v0 = vpop.permute.xlu0 %739 }
 0x169   : > { %v728_v1 = vadd.f32 %v722_v62, %v675_v56  ;;  %v744_v2 = vsel %vm741_vm12, %v738_v21, %v740_v0 }
 0x16a   : > { %v750_v43 = vsel %vm1670_vm8, %v744_v2, 0.0 }
 0x16f   : > { %v734_v31 = vpop.permute.xlu1 %733  ;;  %v781_v8 = vpop.permute.xlu2 %780 }
 0x170   : > { %v743_v3 = vsel %vm741_vm12, %v734_v31, %v736_v37  ;;  %v658_v4 = vpop.permute.xlu0 %657 }
 0x171   : > { %v670_v6 = vmul.f32 %v658_v4, %v648_v15  ;;  %v749_v7 = vsel %vm1670_vm8, %v743_v3, 0.0 }
 0x173   : > { %v673_v9 = vadd.f32 %v670_v6, %v626_v40 }
 0x177   : > { %v785_v10 = vpop.permute.xlu1 %784  ;;  %v708_v20 = vpop.permute.xlu2 %707 }
 0x178   : > { %v791_v11 = vsel %vm788_vm13, %v785_v10, %v787_v51  ;;  %v768_v12 = vpop.permute.xlu0 %767 }
 0x179   : > { %v772_v17 = vmul.f32 %v768_v12, %v750_v43  ;;  %v797_v18 = vsel %vm1532_vm3, %v791_v11, 0.0 }
 0x17b   : > { %v775_v19 = vadd.f32 %v772_v17, %v728_v1 }
 0x17f   : > { %v714_v21 = vpop.permute.xlu1 %713  ;;  %v777_v23 = vpop.permute.xlu2 %776 }
 0x180   : > { %v712_v22 = vpop.permute.xlu0 %711 }
 0x181   : > { %v721_v14 = vsel %vm719_vm11, %v712_v22, %v714_v21 }
 0x182   : > { %v727_v15 = vadd.f32 %v721_v14, %v674_v55 }
 0x187   : > { %v763_v24 = vpop.permute.xlu1 %762  ;;  %v885_v28 = vpop.permute.xlu2 %884 }
 0x188   : > { %v771_v52 = vmul.f32 %v763_v24, %v749_v7  ;;  %v732_v13 = vpop.permute.xlu0 %731 }
 0x189   : > { %v742_v25 = vsel %vm741_vm12, %v730_v63, %v732_v13 }
 0x18a   : > { %v774_v33 = vadd.f32 %v771_v52, %v727_v15  ;;  %v748_v34 = vsel %vm1670_vm8, %v742_v25, 0.0 }
 0x18f   : > { %v815_v35 = vpop.permute.xlu1 %814  ;;  %v865_v37 = vpop.permute.xlu2 %864 }
 0x190   : > { %v819_v36 = vmul.f32 %v815_v35, %v797_v18  ;;  %v783_v29 = vpop.permute.xlu0 %782 }
 0x191   : > { %v790_v44 = vsel %vm788_vm13, %v781_v8, %v783_v29  ;;  %v982_v8 = vld.sshfl [vmem:[#allocation1] sm:$0xff pattern:$0x75316420] }
 0x192   : > { %v822_v38 = vadd.f32 %v819_v36, %v775_v19  ;;  %v796_v61 = vsel %vm1532_vm3, %v790_v44, 0.0  ;;  %984 = vrot.lane.b32.xlu1 %v982_v8, %s1325_s10 }
 0x197   : > { %v758_v39 = vpop.permute.xlu1 %757  ;;  %v883_v49 = vpop.permute.xlu2 %882 }
 0x198   : > { %v770_v27 = vmul.f32 %v758_v39, %v748_v34  ;;  %v710_v40 = vpop.permute.xlu0 %709 }
 0x199   : > { %v720_v42 = vsel %vm719_vm11, %v708_v20, %v710_v40 }
 0x19a   : > { %v726_v5 = vadd.f32 %v720_v42, %v673_v9  ;;  %v983_v9 = vld.sshfl [vmem:[#allocation1 + $0x8] sm:$0xff pattern:$0x75316420] }
 0x19b   : > { %986 = vrot.lane.b32.xlu2 %v983_v9, %s1325_s10 }
 0x19c   : > { %v773_v45 = vadd.f32 %v770_v27, %v726_v5 }
 0x19f   : > { %v810_v32 = vpop.permute.xlu1 %809  ;;  %v861_v41 = vpop.permute.xlu2 %860 }
 0x1a0   : > { %v818_v47 = vmul.f32 %v810_v32, %v796_v61  ;;  %v779_v60 = vpop.permute.xlu0 %778 }
 0x1a1   : > { %v789_v16 = vsel %vm788_vm13, %v777_v23, %v779_v60 }
 0x1a2   : > { %v821_v48 = vadd.f32 %v818_v47, %v774_v33  ;;  %v795_v59 = vsel %vm1532_vm3, %v789_v16, 0.0 }
 0x1a7   : > { %v863_v26 = vpop.permute.xlu1 %862  ;;  %v910_v0 = vpop.permute.xlu2 %909 }
 0x1a8   : > { %v887_v50 = vpop.permute.xlu0 %886  ;;  %v869_v58 = vsel %vm866_vm15, %v863_v26, %v865_v37 }
 0x1a9   : > { %v891_v57 = vsel %vm888_vm14, %v885_v28, %v887_v50  ;;  %v875_v43 = vadd.f32 %v869_v58, %v822_v38  ;;  %v950_v38 = vld [vmem:[%s1844_s5] sm:$0xf] }
 0x1aa   : > { %v897_v46 = vsel %vm1670_vm8, %v891_v57, 0.0 }
 0x1af   : > { %v881_v51 = vpop.permute.xlu1 %880  ;;  %v905_v17 = vpop.permute.xlu2 %904 }
 0x1b0   : > { %v805_v53 = vpop.permute.xlu0 %804  ;;  %v890_v55 = vsel %vm888_vm14, %v881_v51, %v883_v49 }
 0x1b1   : > { %v817_v54 = vmul.f32 %v805_v53, %v795_v59  ;;  %v896_v62 = vsel %vm1670_vm8, %v890_v55, 0.0 }
 0x1b2   : > { %v918_v31 = vmul.f32 %v910_v0, %v896_v62 }
 0x1b3   : > { %v820_v56 = vadd.f32 %v817_v54, %v773_v45 }
 0x1b7   : > { %v859_v63 = vpop.permute.xlu1 %858  ;;  %v929_v24 = vpop.permute.xlu2 %928 }
 0x1b8   : > { %v868_v1 = vsel %vm866_vm15, %v859_v63, %v861_v41  ;;  %v915_v2 = vpop.permute.xlu0 %914 }
 0x1b9   : > { %v874_v3 = vadd.f32 %v868_v1, %v821_v48  ;;  %v919_v4 = vmul.f32 %v915_v2, %v897_v46 }
 0x1bb   : > { %v921_v6 = vadd.f32 %v918_v31, %v874_v3  ;;  %v922_v7 = vadd.f32 %v919_v4, %v875_v43 }
 0x1bf   : > { %v879_v10 = vpop.permute.xlu1 %878 }
 0x1c0   : > { %v877_v11 = vpop.permute.xlu0 %876 }
 0x1c1   : > { %v889_v12 = vsel %vm888_vm14, %v877_v11, %v879_v10 }
 0x1c2   : > { %v895_v18 = vsel %vm1670_vm8, %v889_v12, 0.0 }
 0x1c3   : > { %v917_v22 = vmul.f32 %v905_v17, %v895_v18 }
 0x1c7   : > { %v857_v19 = vpop.permute.xlu1 %856 }
 0x1c8   : > { %v855_v20 = vpop.permute.xlu0 %854 }
 0x1c9   : > { %v867_v21 = vsel %vm866_vm15, %v855_v20, %v857_v19 }
 0x1ca   : > { %v873_v14 = vadd.f32 %v867_v21, %v820_v56 }
 0x1cc   : > { %v920_v15 = vadd.f32 %v917_v22, %v873_v14 }
 0x1ce   : > { %v941_v33 = vadd.f32 %v929_v24, %v920_v15 }
 0x1cf   : > { %v934_v23 = vpop.permute.xlu1 %933 }
 0x1d0   : > { %v942_v52 = vadd.f32 %v934_v23, %v921_v6  ;;  %v939_v13 = vpop.permute.xlu0 %938  ;;  %v944_v28 = vmax.f32 %v941_v33, 0.0 }
 0x1d1   : > { %v943_v25 = vadd.f32 %v939_v13, %v922_v7 }
 0x1d2   : > { %v945_v34 = vmax.f32 %v942_v52, 0.0  ;;  %v947_v29 = vmin.f32 %v944_v28, 6.0 }
 0x1d3   : > { %v946_v35 = vmax.f32 %v943_v25, 0.0 }
 0x1d4   : > { %v948_v36 = vmin.f32 %v945_v34, 6.0 }
 0x1d5   : > { %v949_v30 = vmin.f32 %v946_v35, 6.0 }
 0x1d7   : > { %974 = vmatpush.msra.mxu0 %v949_v30 }
 0x1d8   : > { %v955_v40 = vpop.permute.xlu0 %954 }
 0x1d9   : > { %975 = vmatpush.msra.mxu0 %v948_v36 }
 0x1db   : > { %976 = vmatpush.msra.mxu0 %v947_v29 }
 0x1dc   : > { %1119 = vmatmul.msk.f32.vlgmr.msra.gmra.mxu0 %vm957_vm0, %v950_v38 }
 0x1f5   : > { %v987_v27 = vpop.permute.xlu2 %986 }
 0x204   : > { %v985_v39 = vpop.permute.xlu1 %984 }
 0x205   : > { %v988_v37 = vsel %vm719_vm11, %v985_v39, %v987_v27 }
 0x259   : > { %v978_v42 = vpop.f32.mrf.mxu0 }
 0x25a   : > { %v979_v5 = vadd.f32 %v978_v42, %v955_v40 }
 0x25c   : > { %v990_v44 = vadd.f32 %v988_v37, %v979_v5 }
 0x25e   : > { %991 = vst [vmem:[%s285_s30] sm:$0xf] %v990_v44 }
 0x25f   : > { %1248 = shalt.err (!%p1245_p6)
}
 0x260   : > { %1126 = dma.vmem_to_hbm [thread:$0]  (%p1420_p3), %s1008_s11, 64, %s1010_s13, %s993_s27  }
 0x261 PF: > { %p1132_p7 = scmp.ge.s32.totalorder %s1315_s8, 2  ;;  %s1021_s22 = sand.u32 1, %s1287_s24  }
 0x262   : > { %s1022_s23 = scalar_lea.sflag [#allocation3], %s1021_s22 }
 0x263   : > { %p1129_p9 = pnand %p1132_p7, %p1429_p8 }
 0x265   : > { %p1130_p10 = pneg %p1129_p9 }
 0x267   : > { %1282 = dma.done.wait (%p1130_p10), %s1022_s23, 64  }
 0x268   : > { %1284 = vsyncadd (%p1130_p10), %s1022_s23, 4294967232  ;;  %s20_s8 = sadd.s32 1, %s1315_s8   ;;  %s1867_s28 = sld [smem:[#allocation5_spill]] }
 0x269   : > { %p17_p11 = scmp.ge.s32.totalorder %s20_s8, 6   ;;  %s1868_s14 = sld [smem:[#allocation6_spill]] }
 0x26a   : > { %s1869_s30 = sld [smem:[#allocation7_spill]]  ;;  %s1870_s24 = smov %s1291_s25 }
 0x26b   : > { %s1871_s25 = smov %s1295_s26  ;;  %s1872_s26 = smov %s1438_s19 }
 0x26c   : > { %s1873_s27 = smov %s1307_s29  ;;  %19 = sbr.rel (!%p17_p11) target bundleno = 8 (0x8), region = 92 }
 0x26f   : > { %s1874_s29 = smov %s1868_s14 }
 0x271   :  { %1028 = vsyncpa [#allocation3], 1 }
 0x272   :  { %1030 = vsyncpa [#allocation3 + $0x1], 1 }

</bundles_post_ra>
